<compile_context>
chip_gen: v6e
topology: v6e:2x2x1
jax: 0.10.0
libtpu: 0.0.40
codegen_flags: <defaults>
</compile_context>

<pallas_src>
import functools

import jax
import jax.numpy as jnp
from jax.experimental import pallas as pl
from jax.experimental.pallas import tpu as pltpu


def _round_up(v, m):
    return (v + m - 1) // m * m


def _pick_vmem_limit_bytes():
    # v5e/v6e: 128 MiB physical VMEM per core; v7x: 64 MiB.  Leave headroom for
    # Mosaic internal scratch and pipeline buffers.
    cap = 64 * 1024 * 1024
    try:
        cap = int(getattr(pltpu.get_tpu_info(), "vmem_capacity_bytes", cap))
    except Exception:
        pass
    return max(32 * 1024 * 1024, min(cap - 8 * 1024 * 1024, 100 * 1024 * 1024))


_VMEM_LIMIT_BYTES = _pick_vmem_limit_bytes()

# Left-halo width of the conv2 scratch: keeps the interior store and the hot
# (kh=kw=1) tap at sublane offset 0 (only the kw=0 / kw=2 taps are off-aligned).
_HALO = 8


def _inorm_elu(acc, g_ref, b_ref, inv_hw):
    """Two-pass InstanceNorm (biased var, eps=1e-5) + affine + ELU, all in f32."""
    mean = jnp.sum(acc, axis=0, keepdims=True) * inv_hw           # (1, C)
    cent = acc - mean
    var = jnp.sum(cent * cent, axis=0, keepdims=True) * inv_hw    # (1, C)
    y = cent * jax.lax.rsqrt(var + 1e-5)
    y = y * g_ref[...] + b_ref[...]
    # ELU(alpha=1): exp lands on the EUP slot (frees the VPU / avoids a divide).
    return jnp.where(y > 0.0, y, jnp.exp(jnp.minimum(y, 0.0)) - 1.0)


def _fused_block_kernel(lhs_ref, w1_ref, w2_ref, g1_ref, b1_ref, g2_ref, b2_ref,
                        out1_ref, out2_ref, y1pad_ref, *, Ho, Wo):
    HW = Ho * Wo
    C1p = w1_ref.shape[-1]
    C2p = w2_ref.shape[-1]
    inv_hw = 1.0 / HW

    # ---- conv1: 3x3, stride 2, pad 1 — single wide-K matmul over the
    # ---- wrapper-built bf16 (HW, 9*Cin) im2col tile. -------------------------
    acc1 = jnp.dot(lhs_ref[...], w1_ref[...], preferred_element_type=jnp.float32)
    y1 = _inorm_elu(acc1, g1_ref, b1_ref, inv_hw)             # (HW, C1p) f32
    out1_ref[...] = y1.astype(out1_ref.dtype)                 # lane-dense store

    # ---- conv2: 3x3, stride 1, pad 1, fed directly from a bf16 VMEM halo buf.
    # Zero only the border strips (the interior is fully rewritten each step).
    zrow = jnp.zeros((1, Wo + 2, C1p), y1pad_ref.dtype)
    zcol = jnp.zeros((Ho + 2, 1, C1p), y1pad_ref.dtype)
    y1pad_ref[0:1, _HALO - 1:_HALO + Wo + 1, :] = zrow
    y1pad_ref[Ho + 1:Ho + 2, _HALO - 1:_HALO + Wo + 1, :] = zrow
    y1pad_ref[:, _HALO - 1:_HALO, :] = zcol
    y1pad_ref[:, _HALO + Wo:_HALO + Wo + 1, :] = zcol
    # Interior store: H offset 1 (leading dim, free), W offset 8 (aligned).
    y1pad_ref[1:Ho + 1, _HALO:_HALO + Wo, :] = (
        y1.reshape(Ho, Wo, C1p).astype(y1pad_ref.dtype))

    acc2 = jnp.zeros((HW, C2p), jnp.float32)
    for kh in range(3):
        for kw in range(3):
            tap = y1pad_ref[kh:kh + Ho, _HALO - 1 + kw:_HALO - 1 + kw + Wo, :]
            acc2 = acc2 + jnp.dot(tap.reshape(HW, C1p), w2_ref[kh * 3 + kw],
                                  preferred_element_type=jnp.float32)

    y2 = _inorm_elu(acc2, g2_ref, b2_ref, inv_hw)
    out2_ref[...] = y2.astype(out2_ref.dtype)


def unet_downsampling_block(x_nchw, w1, g1, b1, w2, g2, b2):
    """Fused forward of the whole block.  Returns (out, skip) in NCHW."""
    N, Cin, H, W = x_nchw.shape
    C1 = w1.shape[0]          # out_channels
    C2 = w2.shape[0]          # skip_channels

    Ho = (H - 1) // 2 + 1     # conv(k=3, s=2, p=1) output size
    Wo = (W - 1) // 2 + 1
    HW = Ho * Wo

    K1 = 9 * Cin
    K1p = _round_up(K1, 128)        # lane-dense im2col contraction dim
    C1p = _round_up(C1, 128)        # output lanes -> unmasked 128-wide stores
    C2p = _round_up(C2, 128)
    Wpad = _round_up(_HALO + Wo + 1, 8)

    # conv1 LHS: bf16, channel-last im2col with the 9 taps folded into the
    # minor (lane) dim.  With stride 2 this is ~(9/4)*HW_out*Cin elements, i.e.
    # ~9/8 of the original f32 input bytes once stored in bf16.
    x = jnp.transpose(x_nchw, (0, 2, 3, 1)).astype(jnp.bfloat16)   # NHWC bf16
    xp = jnp.pad(x, ((0, 0), (1, 1), (1, 1), (0, 0)))              # +1 halo
    taps = [xp[:, kh:kh + 2 * Ho - 1:2, kw:kw + 2 * Wo - 1:2, :]
            for kh in range(3) for kw in range(3)]
    lhs = jnp.concatenate(taps, axis=-1).reshape(N, HW, K1)
    lhs = jnp.pad(lhs, ((0, 0), (0, 0), (0, K1p - K1)))

    # Weights -> bf16, zero-padded.  conv1: (9*Cin, C1); conv2: (tap, C1, C2).
    w1t = jnp.transpose(w1, (2, 3, 1, 0)).reshape(K1, C1)
    w1t = jnp.pad(w1t, ((0, K1p - K1), (0, C1p - C1))).astype(jnp.bfloat16)
    w2t = jnp.transpose(w2, (2, 3, 1, 0)).reshape(9, C1, C2)
    w2t = jnp.pad(w2t, ((0, 0), (0, C1p - C1), (0, C2p - C2))).astype(jnp.bfloat16)

    g1p = jnp.pad(g1.astype(jnp.float32), (0, C1p - C1)).reshape(1, C1p)
    b1p = jnp.pad(b1.astype(jnp.float32), (0, C1p - C1)).reshape(1, C1p)
    g2p = jnp.pad(g2.astype(jnp.float32), (0, C2p - C2)).reshape(1, C2p)
    b2p = jnp.pad(b2.astype(jnp.float32), (0, C2p - C2)).reshape(1, C2p)

    kernel = functools.partial(_fused_block_kernel, Ho=Ho, Wo=Wo)

    out1, out2 = pl.pallas_call(
        kernel,
        out_shape=(jax.ShapeDtypeStruct((N, HW, C1p), x_nchw.dtype),
                   jax.ShapeDtypeStruct((N, HW, C2p), x_nchw.dtype)),
        grid=(N,),
        in_specs=[
            pl.BlockSpec((pl.Squeezed(), HW, K1p), lambda n: (n, 0, 0)),  # im2col
            pl.BlockSpec((K1p, C1p), lambda n: (0, 0)),                   # conv1 W
            pl.BlockSpec((9, C1p, C2p), lambda n: (0, 0, 0)),             # conv2 W
            pl.BlockSpec((1, C1p), lambda n: (0, 0)),                     # gamma1
            pl.BlockSpec((1, C1p), lambda n: (0, 0)),                     # beta1
            pl.BlockSpec((1, C2p), lambda n: (0, 0)),                     # gamma2
            pl.BlockSpec((1, C2p), lambda n: (0, 0)),                     # beta2
        ],
        out_specs=(
            pl.BlockSpec((pl.Squeezed(), HW, C1p), lambda n: (n, 0, 0)),
            pl.BlockSpec((pl.Squeezed(), HW, C2p), lambda n: (n, 0, 0)),
        ),
        scratch_shapes=[pltpu.VMEM((Ho + 2, Wpad, C1p), jnp.bfloat16)],
        compiler_params=pltpu.CompilerParams(
            dimension_semantics=("parallel",),
            vmem_limit_bytes=_VMEM_LIMIT_BYTES),
    )(lhs, w1t, w2t, g1p, b1p, g2p, b2p)

    # Back to the PyTorch-facing layout: drop channel padding, NHWC -> NCHW.
    out = out1.reshape(N, Ho, Wo, C1p)[..., :C1].transpose(0, 3, 1, 2)
    skip = out2.reshape(N, Ho, Wo, C2p)[..., :C2].transpose(0, 3, 1, 2)
    return out, skip


_unet_block_jit = jax.jit(unet_downsampling_block)


def _reference_forward(x, w1, g1, b1, w2, g2, b2):
    """Pure-JAX f32 reference of the PyTorch block (training-mode forward)."""
    def conv(inp, w, stride):
        return jax.lax.conv_general_dilated(
            inp, w, window_strides=(stride, stride), padding=((1, 1), (1, 1)),
            dimension_numbers=("NCHW", "OIHW", "NCHW"))

    def inorm_elu(v, g, b):
        mean = jnp.mean(v, axis=(2, 3), keepdims=True)
        var = jnp.mean(jnp.square(v - mean), axis=(2, 3), keepdims=True)
        y = (v - mean) * jax.lax.rsqrt(var + 1e-5)
        y = y * g[None, :, None, None] + b[None, :, None, None]
        return jnp.where(y > 0.0, y, jnp.expm1(y))

    out = inorm_elu(conv(x, w1, 2), g1, b1)
    skip = inorm_elu(conv(out, w2, 1), g2, b2)
    return out, skip


class UnetDownsamplingConvBlockPallas:
    """Pallas equivalent of the PyTorch UnetDownsamplingConvBlock (forward only)."""

    def __init__(self, in_channels, out_channels, skip_channels, key):
        k1, k2 = jax.random.split(key)
        # Deterministic synthetic init (PyTorch weight shape conventions).
        self.w1 = 0.1 * jax.random.normal(k1, (out_channels, in_channels, 3, 3), jnp.float32)
        self.w2 = 0.1 * jax.random.normal(k2, (skip_channels, out_channels, 3, 3), jnp.float32)
        # InstanceNorm2d affine defaults: weight=1, bias=0.
        self.g1 = jnp.ones((out_channels,), jnp.float32)
        self.b1 = jnp.zeros((out_channels,), jnp.float32)
        self.g2 = jnp.ones((skip_channels,), jnp.float32)
        self.b2 = jnp.zeros((skip_channels,), jnp.float32)

    def __call__(self, x):
        return _unet_block_jit(x, self.w1, self.g1, self.b1,
                               self.w2, self.g2, self.b2)


if __name__ == "__main__":
    key = jax.random.PRNGKey(0)
    k_x, k_p = jax.random.split(key)

    N, C_in, H, W = 2, 4, 16, 16
    C_out, C_skip = 8, 6

    x = jax.random.normal(k_x, (N, C_in, H, W), jnp.float32)

    block = UnetDownsamplingConvBlockPallas(C_in, C_out, C_skip, k_p)
    out, skip = block(x)
    out, skip = jax.block_until_ready((out, skip))

    assert out.shape == (N, C_out, H // 2, W // 2), out.shape
    assert skip.shape == (N, C_skip, H // 2, W // 2), skip.shape
    assert bool(jnp.all(jnp.isfinite(out))) and bool(jnp.all(jnp.isfinite(skip)))

    # Loose tolerance: the Pallas path feeds the MXU in bf16.
    ref_out, ref_skip = _reference_forward(x, block.w1, block.g1, block.b1,
                                           block.w2, block.g2, block.b2)
    assert float(jnp.max(jnp.abs(out - ref_out))) < 0.2
    assert float(jnp.max(jnp.abs(skip - ref_skip))) < 0.2

    print("KERNEL_OK")
</pallas_src>

<mosaic_0001>
module attributes {stable_mosaic.version = 11 : i64} {
  func.func @_fused_block_kernel(%arg0: i32, %arg1: memref<1x64x128xbf16, #tpu.memory_space<vmem>>, %arg2: memref<128x128xbf16, #tpu.memory_space<vmem>>, %arg3: memref<9x128x128xbf16, #tpu.memory_space<vmem>>, %arg4: memref<1x128xf32, #tpu.memory_space<vmem>>, %arg5: memref<1x128xf32, #tpu.memory_space<vmem>>, %arg6: memref<1x128xf32, #tpu.memory_space<vmem>>, %arg7: memref<1x128xf32, #tpu.memory_space<vmem>>, %arg8: memref<1x64x128xf32, #tpu.memory_space<vmem>>, %arg9: memref<1x64x128xf32, #tpu.memory_space<vmem>>, %arg10: memref<10x24x128xbf16, #tpu.memory_space<vmem>>) attributes {dimension_semantics = [#tpu.dimension_semantics<parallel>], iteration_bounds = array<i64: 2>, scalar_prefetch = 0 : i64, scratch_operands = 1 : i64, tpu.core_type = #tpu.core_type<tc>, window_params = [{transform_indices = @transform_0, window_bounds = array<i64: 1, 64, 128>}, {pipeline_mode = #tpu.pipeline_mode<synchronous>, transform_indices = @transform_1, window_bounds = array<i64: 128, 128>}, {pipeline_mode = #tpu.pipeline_mode<synchronous>, transform_indices = @transform_2, window_bounds = array<i64: 9, 128, 128>}, {pipeline_mode = #tpu.pipeline_mode<synchronous>, transform_indices = @transform_3, window_bounds = array<i64: 1, 128>}, {pipeline_mode = #tpu.pipeline_mode<synchronous>, transform_indices = @transform_4, window_bounds = array<i64: 1, 128>}, {pipeline_mode = #tpu.pipeline_mode<synchronous>, transform_indices = @transform_5, window_bounds = array<i64: 1, 128>}, {pipeline_mode = #tpu.pipeline_mode<synchronous>, transform_indices = @transform_6, window_bounds = array<i64: 1, 128>}, {transform_indices = @transform_7, window_bounds = array<i64: 1, 64, 128>}, {transform_indices = @transform_8, window_bounds = array<i64: 1, 64, 128>}]} {
    %c0 = arith.constant 0 : index
    %c0_0 = arith.constant 0 : index
    %c0_1 = arith.constant 0 : index
    %0 = vector.load %arg1[%c0, %c0_0, %c0_1] : memref<1x64x128xbf16, #tpu.memory_space<vmem>>, vector<1x64x128xbf16>
    %1 = vector.shape_cast %0 : vector<1x64x128xbf16> to vector<64x128xbf16>
    %c0_2 = arith.constant 0 : index
    %c0_3 = arith.constant 0 : index
    %2 = vector.load %arg2[%c0_2, %c0_3] : memref<128x128xbf16, #tpu.memory_space<vmem>>, vector<128x128xbf16>
    %cst = arith.constant dense<0.000000e+00> : vector<64x128xf32>
    %3 = tpu.matmul %1, %2, %cst {dimension_numbers = #tpu.dot_dimension_numbers<[1], [0], [0], [1], [0, 0, 1, 1], [], []>} : vector<64x128xbf16>, vector<128x128xbf16>, vector<64x128xf32> -> vector<64x128xf32>
    %cst_4 = arith.constant dense<0.000000e+00> : vector<128xf32>
    %4 = vector.multi_reduction <add>, %3, %cst_4 [0] : vector<64x128xf32> to vector<128xf32>
    %5 = vector.shape_cast %4 : vector<128xf32> to vector<1x128xf32>
    %cst_5 = arith.constant 1.562500e-02 : f32
    %6 = vector.broadcast %cst_5 : f32 to vector<1x128xf32>
    %7 = arith.mulf %5, %6 : vector<1x128xf32>
    %8 = vector.broadcast %7 : vector<1x128xf32> to vector<64x128xf32>
    %9 = arith.subf %3, %8 : vector<64x128xf32>
    %10 = arith.mulf %9, %9 : vector<64x128xf32>
    %cst_6 = arith.constant dense<0.000000e+00> : vector<128xf32>
    %11 = vector.multi_reduction <add>, %10, %cst_6 [0] : vector<64x128xf32> to vector<128xf32>
    %12 = vector.shape_cast %11 : vector<128xf32> to vector<1x128xf32>
    %cst_7 = arith.constant 1.562500e-02 : f32
    %13 = vector.broadcast %cst_7 : f32 to vector<1x128xf32>
    %14 = arith.mulf %12, %13 : vector<1x128xf32>
    %cst_8 = arith.constant 9.99999974E-6 : f32
    %15 = vector.broadcast %cst_8 : f32 to vector<1x128xf32>
    %16 = arith.addf %14, %15 : vector<1x128xf32>
    %17 = math.rsqrt %16 : vector<1x128xf32>
    %18 = vector.broadcast %17 : vector<1x128xf32> to vector<64x128xf32>
    %19 = arith.mulf %9, %18 : vector<64x128xf32>
    %c0_9 = arith.constant 0 : index
    %c0_10 = arith.constant 0 : index
    %20 = vector.load %arg4[%c0_9, %c0_10] : memref<1x128xf32, #tpu.memory_space<vmem>>, vector<1x128xf32>
    %21 = vector.broadcast %20 : vector<1x128xf32> to vector<64x128xf32>
    %22 = arith.mulf %19, %21 : vector<64x128xf32>
    %c0_11 = arith.constant 0 : index
    %c0_12 = arith.constant 0 : index
    %23 = vector.load %arg5[%c0_11, %c0_12] : memref<1x128xf32, #tpu.memory_space<vmem>>, vector<1x128xf32>
    %24 = vector.broadcast %23 : vector<1x128xf32> to vector<64x128xf32>
    %25 = arith.addf %22, %24 : vector<64x128xf32>
    %cst_13 = arith.constant 0.000000e+00 : f32
    %26 = vector.broadcast %cst_13 : f32 to vector<64x128xf32>
    %27 = arith.cmpf ogt, %25, %26 : vector<64x128xf32>
    %cst_14 = arith.constant 0.000000e+00 : f32
    %28 = vector.broadcast %cst_14 : f32 to vector<64x128xf32>
    %29 = arith.minimumf %25, %28 : vector<64x128xf32>
    %30 = math.exp %29 : vector<64x128xf32>
    %cst_15 = arith.constant 1.000000e+00 : f32
    %31 = vector.broadcast %cst_15 : f32 to vector<64x128xf32>
    %32 = arith.subf %30, %31 : vector<64x128xf32>
    %33 = arith.select %27, %25, %32 : vector<64x128xi1>, vector<64x128xf32>
    %c0_16 = arith.constant 0 : index
    %c0_17 = arith.constant 0 : index
    %c0_18 = arith.constant 0 : index
    %34 = vector.load %arg8[%c0_16, %c0_17, %c0_18] : memref<1x64x128xf32, #tpu.memory_space<vmem>>, vector<1x64x128xf32>
    %35 = vector.shape_cast %34 : vector<1x64x128xf32> to vector<64x128xf32>
    %36 = vector.shape_cast %33 : vector<64x128xf32> to vector<1x64x128xf32>
    tpu.vector_store %arg8[%c0_16, %c0_17, %c0_18], %36 {strides = array<i32>} : memref<1x64x128xf32, #tpu.memory_space<vmem>>, vector<1x64x128xf32>,
    %cst_19 = arith.constant 0.000000e+00 : bf16
    %37 = vector.broadcast %cst_19 : bf16 to vector<1x10x128xbf16>
    %cst_20 = arith.constant 0.000000e+00 : bf16
    %38 = vector.broadcast %cst_20 : bf16 to vector<10x1x128xbf16>
    %c0_21 = arith.constant 0 : index
    %c7 = arith.constant 7 : index
    %c0_22 = arith.constant 0 : index
    %39 = vector.load %arg10[%c0_21, %c7, %c0_22] : memref<10x24x128xbf16, #tpu.memory_space<vmem>>, vector<1x10x128xbf16>
    tpu.vector_store %arg10[%c0_21, %c7, %c0_22], %37 {strides = array<i32>} : memref<10x24x128xbf16, #tpu.memory_space<vmem>>, vector<1x10x128xbf16>,
    %c9 = arith.constant 9 : index
    %c7_23 = arith.constant 7 : index
    %c0_24 = arith.constant 0 : index
    %40 = vector.load %arg10[%c9, %c7_23, %c0_24] : memref<10x24x128xbf16, #tpu.memory_space<vmem>>, vector<1x10x128xbf16>
    tpu.vector_store %arg10[%c9, %c7_23, %c0_24], %37 {strides = array<i32>} : memref<10x24x128xbf16, #tpu.memory_space<vmem>>, vector<1x10x128xbf16>,
    %c0_25 = arith.constant 0 : index
    %c7_26 = arith.constant 7 : index
    %c0_27 = arith.constant 0 : index
    %41 = vector.load %arg10[%c0_25, %c7_26, %c0_27] : memref<10x24x128xbf16, #tpu.memory_space<vmem>>, vector<10x1x128xbf16>
    tpu.vector_store %arg10[%c0_25, %c7_26, %c0_27], %38 {strides = array<i32>} : memref<10x24x128xbf16, #tpu.memory_space<vmem>>, vector<10x1x128xbf16>,
    %c0_28 = arith.constant 0 : index
    %c16 = arith.constant 16 : index
    %c0_29 = arith.constant 0 : index
    %42 = vector.load %arg10[%c0_28, %c16, %c0_29] : memref<10x24x128xbf16, #tpu.memory_space<vmem>>, vector<10x1x128xbf16>
    tpu.vector_store %arg10[%c0_28, %c16, %c0_29], %38 {strides = array<i32>} : memref<10x24x128xbf16, #tpu.memory_space<vmem>>, vector<10x1x128xbf16>,
    %43 = vector.shape_cast %33 : vector<64x128xf32> to vector<8x8x128xf32>
    %44 = arith.truncf %43 : vector<8x8x128xf32> to vector<8x8x128xbf16>
    %c1 = arith.constant 1 : index
    %c8 = arith.constant 8 : index
    %c0_30 = arith.constant 0 : index
    %45 = vector.load %arg10[%c1, %c8, %c0_30] : memref<10x24x128xbf16, #tpu.memory_space<vmem>>, vector<8x8x128xbf16>
    tpu.vector_store %arg10[%c1, %c8, %c0_30], %44 {strides = array<i32>} : memref<10x24x128xbf16, #tpu.memory_space<vmem>>, vector<8x8x128xbf16>,
    %cst_31 = arith.constant 0.000000e+00 : f32
    %46 = vector.broadcast %cst_31 : f32 to vector<64x128xf32>
    %c0_32 = arith.constant 0 : index
    %c7_33 = arith.constant 7 : index
    %c0_34 = arith.constant 0 : index
    %47 = vector.load %arg10[%c0_32, %c7_33, %c0_34] : memref<10x24x128xbf16, #tpu.memory_space<vmem>>, vector<8x8x128xbf16>
    %48 = vector.shape_cast %47 : vector<8x8x128xbf16> to vector<64x128xbf16>
    %c0_35 = arith.constant 0 : index
    %c0_36 = arith.constant 0 : index
    %c0_37 = arith.constant 0 : index
    %49 = vector.load %arg3[%c0_35, %c0_36, %c0_37] : memref<9x128x128xbf16, #tpu.memory_space<vmem>>, vector<1x128x128xbf16>
    %50 = vector.shape_cast %49 : vector<1x128x128xbf16> to vector<128x128xbf16>
    %cst_38 = arith.constant dense<0.000000e+00> : vector<64x128xf32>
    %51 = tpu.matmul %48, %50, %cst_38 {dimension_numbers = #tpu.dot_dimension_numbers<[1], [0], [0], [1], [0, 0, 1, 1], [], []>} : vector<64x128xbf16>, vector<128x128xbf16>, vector<64x128xf32> -> vector<64x128xf32>
    %52 = arith.addf %46, %51 : vector<64x128xf32>
    %c0_39 = arith.constant 0 : index
    %c8_40 = arith.constant 8 : index
    %c0_41 = arith.constant 0 : index
    %53 = vector.load %arg10[%c0_39, %c8_40, %c0_41] : memref<10x24x128xbf16, #tpu.memory_space<vmem>>, vector<8x8x128xbf16>
    %54 = vector.shape_cast %53 : vector<8x8x128xbf16> to vector<64x128xbf16>
    %c1_42 = arith.constant 1 : index
    %c0_43 = arith.constant 0 : index
    %c0_44 = arith.constant 0 : index
    %55 = vector.load %arg3[%c1_42, %c0_43, %c0_44] : memref<9x128x128xbf16, #tpu.memory_space<vmem>>, vector<1x128x128xbf16>
    %56 = vector.shape_cast %55 : vector<1x128x128xbf16> to vector<128x128xbf16>
    %cst_45 = arith.constant dense<0.000000e+00> : vector<64x128xf32>
    %57 = tpu.matmul %54, %56, %cst_45 {dimension_numbers = #tpu.dot_dimension_numbers<[1], [0], [0], [1], [0, 0, 1, 1], [], []>} : vector<64x128xbf16>, vector<128x128xbf16>, vector<64x128xf32> -> vector<64x128xf32>
    %58 = arith.addf %52, %57 : vector<64x128xf32>
    %c0_46 = arith.constant 0 : index
    %c9_47 = arith.constant 9 : index
    %c0_48 = arith.constant 0 : index
    %59 = vector.load %arg10[%c0_46, %c9_47, %c0_48] : memref<10x24x128xbf16, #tpu.memory_space<vmem>>, vector<8x8x128xbf16>
    %60 = vector.shape_cast %59 : vector<8x8x128xbf16> to vector<64x128xbf16>
    %c2 = arith.constant 2 : index
    %c0_49 = arith.constant 0 : index
    %c0_50 = arith.constant 0 : index
    %61 = vector.load %arg3[%c2, %c0_49, %c0_50] : memref<9x128x128xbf16, #tpu.memory_space<vmem>>, vector<1x128x128xbf16>
    %62 = vector.shape_cast %61 : vector<1x128x128xbf16> to vector<128x128xbf16>
    %cst_51 = arith.constant dense<0.000000e+00> : vector<64x128xf32>
    %63 = tpu.matmul %60, %62, %cst_51 {dimension_numbers = #tpu.dot_dimension_numbers<[1], [0], [0], [1], [0, 0, 1, 1], [], []>} : vector<64x128xbf16>, vector<128x128xbf16>, vector<64x128xf32> -> vector<64x128xf32>
    %64 = arith.addf %58, %63 : vector<64x128xf32>
    %c1_52 = arith.constant 1 : index
    %c7_53 = arith.constant 7 : index
    %c0_54 = arith.constant 0 : index
    %65 = vector.load %arg10[%c1_52, %c7_53, %c0_54] : memref<10x24x128xbf16, #tpu.memory_space<vmem>>, vector<8x8x128xbf16>
    %66 = vector.shape_cast %65 : vector<8x8x128xbf16> to vector<64x128xbf16>
    %c3 = arith.constant 3 : index
    %c0_55 = arith.constant 0 : index
    %c0_56 = arith.constant 0 : index
    %67 = vector.load %arg3[%c3, %c0_55, %c0_56] : memref<9x128x128xbf16, #tpu.memory_space<vmem>>, vector<1x128x128xbf16>
    %68 = vector.shape_cast %67 : vector<1x128x128xbf16> to vector<128x128xbf16>
    %cst_57 = arith.constant dense<0.000000e+00> : vector<64x128xf32>
    %69 = tpu.matmul %66, %68, %cst_57 {dimension_numbers = #tpu.dot_dimension_numbers<[1], [0], [0], [1], [0, 0, 1, 1], [], []>} : vector<64x128xbf16>, vector<128x128xbf16>, vector<64x128xf32> -> vector<64x128xf32>
    %70 = arith.addf %64, %69 : vector<64x128xf32>
    %c1_58 = arith.constant 1 : index
    %c8_59 = arith.constant 8 : index
    %c0_60 = arith.constant 0 : index
    %71 = vector.load %arg10[%c1_58, %c8_59, %c0_60] : memref<10x24x128xbf16, #tpu.memory_space<vmem>>, vector<8x8x128xbf16>
    %72 = vector.shape_cast %71 : vector<8x8x128xbf16> to vector<64x128xbf16>
    %c4 = arith.constant 4 : index
    %c0_61 = arith.constant 0 : index
    %c0_62 = arith.constant 0 : index
    %73 = vector.load %arg3[%c4, %c0_61, %c0_62] : memref<9x128x128xbf16, #tpu.memory_space<vmem>>, vector<1x128x128xbf16>
    %74 = vector.shape_cast %73 : vector<1x128x128xbf16> to vector<128x128xbf16>
    %cst_63 = arith.constant dense<0.000000e+00> : vector<64x128xf32>
    %75 = tpu.matmul %72, %74, %cst_63 {dimension_numbers = #tpu.dot_dimension_numbers<[1], [0], [0], [1], [0, 0, 1, 1], [], []>} : vector<64x128xbf16>, vector<128x128xbf16>, vector<64x128xf32> -> vector<64x128xf32>
    %76 = arith.addf %70, %75 : vector<64x128xf32>
    %c1_64 = arith.constant 1 : index
    %c9_65 = arith.constant 9 : index
    %c0_66 = arith.constant 0 : index
    %77 = vector.load %arg10[%c1_64, %c9_65, %c0_66] : memref<10x24x128xbf16, #tpu.memory_space<vmem>>, vector<8x8x128xbf16>
    %78 = vector.shape_cast %77 : vector<8x8x128xbf16> to vector<64x128xbf16>
    %c5 = arith.constant 5 : index
    %c0_67 = arith.constant 0 : index
    %c0_68 = arith.constant 0 : index
    %79 = vector.load %arg3[%c5, %c0_67, %c0_68] : memref<9x128x128xbf16, #tpu.memory_space<vmem>>, vector<1x128x128xbf16>
    %80 = vector.shape_cast %79 : vector<1x128x128xbf16> to vector<128x128xbf16>
    %cst_69 = arith.constant dense<0.000000e+00> : vector<64x128xf32>
    %81 = tpu.matmul %78, %80, %cst_69 {dimension_numbers = #tpu.dot_dimension_numbers<[1], [0], [0], [1], [0, 0, 1, 1], [], []>} : vector<64x128xbf16>, vector<128x128xbf16>, vector<64x128xf32> -> vector<64x128xf32>
    %82 = arith.addf %76, %81 : vector<64x128xf32>
    %c2_70 = arith.constant 2 : index
    %c7_71 = arith.constant 7 : index
    %c0_72 = arith.constant 0 : index
    %83 = vector.load %arg10[%c2_70, %c7_71, %c0_72] : memref<10x24x128xbf16, #tpu.memory_space<vmem>>, vector<8x8x128xbf16>
    %84 = vector.shape_cast %83 : vector<8x8x128xbf16> to vector<64x128xbf16>
    %c6 = arith.constant 6 : index
    %c0_73 = arith.constant 0 : index
    %c0_74 = arith.constant 0 : index
    %85 = vector.load %arg3[%c6, %c0_73, %c0_74] : memref<9x128x128xbf16, #tpu.memory_space<vmem>>, vector<1x128x128xbf16>
    %86 = vector.shape_cast %85 : vector<1x128x128xbf16> to vector<128x128xbf16>
    %cst_75 = arith.constant dense<0.000000e+00> : vector<64x128xf32>
    %87 = tpu.matmul %84, %86, %cst_75 {dimension_numbers = #tpu.dot_dimension_numbers<[1], [0], [0], [1], [0, 0, 1, 1], [], []>} : vector<64x128xbf16>, vector<128x128xbf16>, vector<64x128xf32> -> vector<64x128xf32>
    %88 = arith.addf %82, %87 : vector<64x128xf32>
    %c2_76 = arith.constant 2 : index
    %c8_77 = arith.constant 8 : index
    %c0_78 = arith.constant 0 : index
    %89 = vector.load %arg10[%c2_76, %c8_77, %c0_78] : memref<10x24x128xbf16, #tpu.memory_space<vmem>>, vector<8x8x128xbf16>
    %90 = vector.shape_cast %89 : vector<8x8x128xbf16> to vector<64x128xbf16>
    %c7_79 = arith.constant 7 : index
    %c0_80 = arith.constant 0 : index
    %c0_81 = arith.constant 0 : index
    %91 = vector.load %arg3[%c7_79, %c0_80, %c0_81] : memref<9x128x128xbf16, #tpu.memory_space<vmem>>, vector<1x128x128xbf16>
    %92 = vector.shape_cast %91 : vector<1x128x128xbf16> to vector<128x128xbf16>
    %cst_82 = arith.constant dense<0.000000e+00> : vector<64x128xf32>
    %93 = tpu.matmul %90, %92, %cst_82 {dimension_numbers = #tpu.dot_dimension_numbers<[1], [0], [0], [1], [0, 0, 1, 1], [], []>} : vector<64x128xbf16>, vector<128x128xbf16>, vector<64x128xf32> -> vector<64x128xf32>
    %94 = arith.addf %88, %93 : vector<64x128xf32>
    %c2_83 = arith.constant 2 : index
    %c9_84 = arith.constant 9 : index
    %c0_85 = arith.constant 0 : index
    %95 = vector.load %arg10[%c2_83, %c9_84, %c0_85] : memref<10x24x128xbf16, #tpu.memory_space<vmem>>, vector<8x8x128xbf16>
    %96 = vector.shape_cast %95 : vector<8x8x128xbf16> to vector<64x128xbf16>
    %c8_86 = arith.constant 8 : index
    %c0_87 = arith.constant 0 : index
    %c0_88 = arith.constant 0 : index
    %97 = vector.load %arg3[%c8_86, %c0_87, %c0_88] : memref<9x128x128xbf16, #tpu.memory_space<vmem>>, vector<1x128x128xbf16>
    %98 = vector.shape_cast %97 : vector<1x128x128xbf16> to vector<128x128xbf16>
    %cst_89 = arith.constant dense<0.000000e+00> : vector<64x128xf32>
    %99 = tpu.matmul %96, %98, %cst_89 {dimension_numbers = #tpu.dot_dimension_numbers<[1], [0], [0], [1], [0, 0, 1, 1], [], []>} : vector<64x128xbf16>, vector<128x128xbf16>, vector<64x128xf32> -> vector<64x128xf32>
    %100 = arith.addf %94, %99 : vector<64x128xf32>
    %cst_90 = arith.constant dense<0.000000e+00> : vector<128xf32>
    %101 = vector.multi_reduction <add>, %100, %cst_90 [0] : vector<64x128xf32> to vector<128xf32>
    %102 = vector.shape_cast %101 : vector<128xf32> to vector<1x128xf32>
    %cst_91 = arith.constant 1.562500e-02 : f32
    %103 = vector.broadcast %cst_91 : f32 to vector<1x128xf32>
    %104 = arith.mulf %102, %103 : vector<1x128xf32>
    %105 = vector.broadcast %104 : vector<1x128xf32> to vector<64x128xf32>
    %106 = arith.subf %100, %105 : vector<64x128xf32>
    %107 = arith.mulf %106, %106 : vector<64x128xf32>
    %cst_92 = arith.constant dense<0.000000e+00> : vector<128xf32>
    %108 = vector.multi_reduction <add>, %107, %cst_92 [0] : vector<64x128xf32> to vector<128xf32>
    %109 = vector.shape_cast %108 : vector<128xf32> to vector<1x128xf32>
    %cst_93 = arith.constant 1.562500e-02 : f32
    %110 = vector.broadcast %cst_93 : f32 to vector<1x128xf32>
    %111 = arith.mulf %109, %110 : vector<1x128xf32>
    %cst_94 = arith.constant 9.99999974E-6 : f32
    %112 = vector.broadcast %cst_94 : f32 to vector<1x128xf32>
    %113 = arith.addf %111, %112 : vector<1x128xf32>
    %114 = math.rsqrt %113 : vector<1x128xf32>
    %115 = vector.broadcast %114 : vector<1x128xf32> to vector<64x128xf32>
    %116 = arith.mulf %106, %115 : vector<64x128xf32>
    %c0_95 = arith.constant 0 : index
    %c0_96 = arith.constant 0 : index
    %117 = vector.load %arg6[%c0_95, %c0_96] : memref<1x128xf32, #tpu.memory_space<vmem>>, vector<1x128xf32>
    %118 = vector.broadcast %117 : vector<1x128xf32> to vector<64x128xf32>
    %119 = arith.mulf %116, %118 : vector<64x128xf32>
    %c0_97 = arith.constant 0 : index
    %c0_98 = arith.constant 0 : index
    %120 = vector.load %arg7[%c0_97, %c0_98] : memref<1x128xf32, #tpu.memory_space<vmem>>, vector<1x128xf32>
    %121 = vector.broadcast %120 : vector<1x128xf32> to vector<64x128xf32>
    %122 = arith.addf %119, %121 : vector<64x128xf32>
    %cst_99 = arith.constant 0.000000e+00 : f32
    %123 = vector.broadcast %cst_99 : f32 to vector<64x128xf32>
    %124 = arith.cmpf ogt, %122, %123 : vector<64x128xf32>
    %cst_100 = arith.constant 0.000000e+00 : f32
    %125 = vector.broadcast %cst_100 : f32 to vector<64x128xf32>
    %126 = arith.minimumf %122, %125 : vector<64x128xf32>
    %127 = math.exp %126 : vector<64x128xf32>
    %cst_101 = arith.constant 1.000000e+00 : f32
    %128 = vector.broadcast %cst_101 : f32 to vector<64x128xf32>
    %129 = arith.subf %127, %128 : vector<64x128xf32>
    %130 = arith.select %124, %122, %129 : vector<64x128xi1>, vector<64x128xf32>
    %c0_102 = arith.constant 0 : index
    %c0_103 = arith.constant 0 : index
    %c0_104 = arith.constant 0 : index
    %131 = vector.load %arg9[%c0_102, %c0_103, %c0_104] : memref<1x64x128xf32, #tpu.memory_space<vmem>>, vector<1x64x128xf32>
    %132 = vector.shape_cast %131 : vector<1x64x128xf32> to vector<64x128xf32>
    %133 = vector.shape_cast %130 : vector<64x128xf32> to vector<1x64x128xf32>
    tpu.vector_store %arg9[%c0_102, %c0_103, %c0_104], %133 {strides = array<i32>} : memref<1x64x128xf32, #tpu.memory_space<vmem>>, vector<1x64x128xf32>,
    return
  }
  func.func @transform_0(%arg0: i32) -> (i32, i32, i32) {
    %c0_i32 = arith.constant 0 : i32
    %c0_i32_0 = arith.constant 0 : i32
    %c0_i32_1 = arith.constant 0 : i32
    return %arg0, %c0_i32, %c0_i32_0 : i32, i32, i32
  }
  func.func @transform_1(%arg0: i32) -> (i32, i32) {
    %c0_i32 = arith.constant 0 : i32
    %c0_i32_0 = arith.constant 0 : i32
    %c0_i32_1 = arith.constant 0 : i32
    return %c0_i32, %c0_i32_0 : i32, i32
  }
  func.func @transform_2(%arg0: i32) -> (i32, i32, i32) {
    %c0_i32 = arith.constant 0 : i32
    %c0_i32_0 = arith.constant 0 : i32
    %c0_i32_1 = arith.constant 0 : i32
    %c0_i32_2 = arith.constant 0 : i32
    return %c0_i32, %c0_i32_0, %c0_i32_1 : i32, i32, i32
  }
  func.func @transform_3(%arg0: i32) -> (i32, i32) {
    %c0_i32 = arith.constant 0 : i32
    %c0_i32_0 = arith.constant 0 : i32
    %c0_i32_1 = arith.constant 0 : i32
    return %c0_i32, %c0_i32_0 : i32, i32
  }
  func.func @transform_4(%arg0: i32) -> (i32, i32) {
    %c0_i32 = arith.constant 0 : i32
    %c0_i32_0 = arith.constant 0 : i32
    %c0_i32_1 = arith.constant 0 : i32
    return %c0_i32, %c0_i32_0 : i32, i32
  }
  func.func @transform_5(%arg0: i32) -> (i32, i32) {
    %c0_i32 = arith.constant 0 : i32
    %c0_i32_0 = arith.constant 0 : i32
    %c0_i32_1 = arith.constant 0 : i32
    return %c0_i32, %c0_i32_0 : i32, i32
  }
  func.func @transform_6(%arg0: i32) -> (i32, i32) {
    %c0_i32 = arith.constant 0 : i32
    %c0_i32_0 = arith.constant 0 : i32
    %c0_i32_1 = arith.constant 0 : i32
    return %c0_i32, %c0_i32_0 : i32, i32
  }
  func.func @transform_7(%arg0: i32) -> (i32, i32, i32) {
    %c0_i32 = arith.constant 0 : i32
    %c0_i32_0 = arith.constant 0 : i32
    %c0_i32_1 = arith.constant 0 : i32
    return %arg0, %c0_i32, %c0_i32_0 : i32, i32, i32
  }
  func.func @transform_8(%arg0: i32) -> (i32, i32, i32) {
    %c0_i32 = arith.constant 0 : i32
    %c0_i32_0 = arith.constant 0 : i32
    %c0_i32_1 = arith.constant 0 : i32
    return %arg0, %c0_i32, %c0_i32_0 : i32, i32, i32
  }
}

</mosaic_0001>

<bundles_post_ra>
// kernel: unet_downsampling_block.1
= control target key start
LH: loop header
LB: loop body
LE: loop exit
PB: predicated region body
PF: predicated region fallthrough
CT: control target
= control target key end

     0   :  { %s3953_s27 = smov 0   ;;  %s4751_s0 = inlined_call_operand.vmem [shape: bf16[2,64,128], index: 0, kind: input, shape index: {}]   ;;  %s4752_s1 = inlined_call_operand.vmem [shape: bf16[128,128], index: 1, kind: input, shape index: {}]   ;;  %s4753_s2 = inlined_call_operand.vmem [shape: bf16[9,128,128], index: 2, kind: input, shape index: {}]   ;;  %s4754_s3 = inlined_call_operand.vmem [shape: f32[1,128], index: 3, kind: input, shape index: {}]   ;;  %s4755_s4 = inlined_call_operand.vmem [shape: f32[1,128], index: 4, kind: input, shape index: {}]   ;;  %s4756_s5 = inlined_call_operand.vmem [shape: f32[1,128], index: 5, kind: input, shape index: {}]   ;;  %s4757_s6 = inlined_call_operand.vmem [shape: f32[1,128], index: 6, kind: input, shape index: {}]   ;;  %s4758_s7 = inlined_call_operand.vmem [shape: f32[2,64,128], index: 7, kind: output, shape index: {0}]   ;;  %s4759_s8 = inlined_call_operand.vmem [shape: f32[2,64,128], index: 8, kind: output, shape index: {1}]  }
   0x1 LB: > { %s3090_s28 = sadd.s32 4294967295, %s3905_s27   ;;  %p3094_p0 = scmp.ge.s32.totalorder %s3905_s27, 1  ;;  %s3905_s27 = sphi %s3953_s27, %s19_s27  }
   0x2   : > { %p265_p1 = scmp.lt.s32.totalorder %s3905_s27, 3 }
   0x4   : > { %p266_p2 = pnand %p3094_p0, %p265_p1 }
   0x6   : > { %269 = sbr.rel (%p266_p2) target bundleno = 802 (0x322), region = 48 }
   0xb   : > { %v3767_v0 = vld [vmem:[%s4752_s1 + $0x38] sm:$0xff]   ;;  %p304_p3 = scmp.lt.s32.totalorder %s3090_s28, 1  ;;  %v3768_v1 = vld [vmem:[%s4752_s1 + $0x30] sm:$0xff]   ;;  %v3769_v2 = vld [vmem:[%s4752_s1 + $0x28] sm:$0xff]   ;;  %vm621_vm0 = vcmask 1043459   ;;  %vm628_vm4 = vcmask 1040384  }
   0xc   : > { %3518 = vmatprep.subr.bf16.mxu0 %v3767_v0  ;;  %v3770_v3 = vld [vmem:[%s4752_s1 + $0x20] sm:$0xff]   ;;  %v3771_v5 = vld [vmem:[%s4752_s1 + $0x18] sm:$0xff]   ;;  %v3772_v6 = vld [vmem:[%s4752_s1 + $0x10] sm:$0xff]   ;;  %vm622_vm1 = vsmask.f32 7950  ;;  %v3907_v32 = vmov 0  }
   0xd   : > { %s4791_s28 = smov (!%p304_p3, %s3090_s28), 1  ;;  %3519 = vmatpush3.bf16.msra.mxu0 %v3767_v0  ;;  %v3773_v7 = vld [vmem:[%s4752_s1 + $0x8] sm:$0xff]   ;;  %v3774_v8 = vld [vmem:[%s4752_s1] sm:$0xff]   ;;  %v3779_v12 = vld [vmem:[%s4753_s2 + $0x78] sm:$0xff]   ;;  %vm629_vm3 = vsmask.f32 256 }
   0xe   : > { %3520 = vmatprep.subr.bf16.mxu0 %v3768_v1  ;;  %s3395_s13 = sshll.u32 %s4791_s28, 5  ;;  %3542 = vmatprep.subr.bf16.mxu1 %v3779_v12  ;;  %v3780_v13 = vld [vmem:[%s4753_s2 + $0x70] sm:$0xff]   ;;  %v3781_v14 = vld [vmem:[%s4753_s2 + $0x38] sm:$0xff]   ;;  %v3782_v15 = vld [vmem:[%s4753_s2 + $0x68] sm:$0xff]   ;;  %627 = vst [vmem:[#allocation2 + $0x4] sm:$0xf] %v3907_v32 }
   0xf   : > { %s308_s16 = scalar_lea.vmem %s4751_s0, %s3395_s13  ;;  %3543 = vmatpush3.bf16.msra.mxu1 %v3779_v12  ;;  %v3783_v16 = vld [vmem:[%s4753_s2 + $0x30] sm:$0xff]   ;;  %v3784_v17 = vld [vmem:[%s4753_s2 + $0x60] sm:$0xff]   ;;  %v3785_v18 = vld [vmem:[%s4753_s2 + $0x28] sm:$0xff]   ;;  %638 = vst [vmem:[#allocation2 + $0x70] sm:$0xf] %v3907_v32  ;;  %s3396_s29 = sshll.u32 %s4791_s28, 6 }
  0x10   : > { %v3775_v4 = vld [vmem:[%s308_s16] sm:$0xff]   ;;  %v3776_v9 = vld [vmem:[%s308_s16 + $0x8] sm:$0xff]   ;;  %v3777_v10 = vld [vmem:[%s308_s16 + $0x10] sm:$0xff]   ;;  %3544 = vmatprep.subr.bf16.mxu1 %v3780_v13  ;;  %vm735_vm6 = vsmask.f32 4368  ;;  %s4172_s10 = scalar_lea.vmem %s4758_s7, %s3396_s29  ;;  %s4734_s11 = scalar_lea.vmem %s4759_s8, %s3396_s29 }
  0x11   : > { %3521 = vmatpush3.bf16.msra.mxu0 %v3768_v1  ;;  %3534 = vmatprep.mubr.bf16.mxu0 %v3775_v4  ;;  %v3778_v11 = vld [vmem:[%s308_s16 + $0x18] sm:$0xff]   ;;  %vm4012_vm2 = vmand %vm621_vm0, %vm622_vm1  ;;  %v624_v20 = vld [vmem:[#allocation2] sm:$0x8]  ;;  %vm1156_vm7 = vsmask.f32 3328 }
  0x12   : > { %3522 = vmatprep.subr.bf16.mxu0 %v3769_v2  ;;  %v3786_v21 = vld [vmem:[%s4753_s2 + $0x58] sm:$0xff]   ;;  %v625_v22 = vsel %vm4012_vm2, 0, %v624_v20  ;;  %vm4022_vm5 = vmand %vm628_vm4, %vm629_vm3  ;;  %v631_v24 = vld [vmem:[#allocation2 + $0x8] sm:$0x1]  ;;  %vm1157_vm8 = vsmask.f32 7440 }
  0x13   : > { %3545 = vmatpush3.bf16.msra.mxu1 %v3780_v13  ;;  %626 = vst [vmem:[#allocation2] sm:$0x8] %v625_v22  ;;  %v3787_v25 = vld [vmem:[%s4753_s2 + $0x20] sm:$0xff]   ;;  %v632_v26 = vsel %vm4022_vm5, 0, %v631_v24  ;;  %v3788_v27 = vld [vmem:[%s4753_s2 + $0x50] sm:$0xff]   ;;  %v3789_v28 = vld [vmem:[%s4753_s2 + $0x18] sm:$0xff]  }
  0x14   : > { %3546 = vmatprep.subr.bf16.mxu1 %v3782_v15  ;;  %633 = vst [vmem:[#allocation2 + $0x8] sm:$0x1] %v632_v26  ;;  %v3790_v29 = vld [vmem:[%s4753_s2 + $0x48] sm:$0xff]   ;;  %v3791_v30 = vld [vmem:[%s4753_s2 + $0x10] sm:$0xff]   ;;  %v3792_v31 = vld [vmem:[%s4753_s2 + $0x40] sm:$0xff]  }
  0x15   : > { %3523 = vmatpush3.bf16.msra.mxu0 %v3769_v2  ;;  %v3793_v33 = vld [vmem:[%s4753_s2 + $0x8] sm:$0xff]   ;;  %v648_v38 = vld [vmem:[#allocation2 + $0x18] sm:$0x8]  ;;  %v651_v39 = vld [vmem:[#allocation2 + $0x24] sm:$0x8] }
  0x16   : > { %3524 = vmatprep.subr.bf16.mxu0 %v3770_v3  ;;  %v645_v35 = vld [vmem:[#allocation2 + $0xc] sm:$0x8]  ;;  %v649_v40 = vsel %vm4012_vm2, 0, %v648_v38  ;;  %v652_v41 = vsel %vm4012_vm2, 0, %v651_v39  ;;  %v654_v42 = vld [vmem:[#allocation2 + $0x30] sm:$0x8]  ;;  %vm4213_vm1 = vmor %vm629_vm3, %vm735_vm6 }
  0x17   : > { %3547 = vmatpush3.bf16.msra.mxu1 %v3782_v15  ;;  %v646_v37 = vsel %vm4012_vm2, 0, %v645_v35  ;;  %v657_v43 = vld [vmem:[#allocation2 + $0x3c] sm:$0x8]  ;;  %650 = vst [vmem:[#allocation2 + $0x18] sm:$0x8] %v649_v40  ;;  %v655_v44 = vsel %vm4012_vm2, 0, %v654_v42 }
  0x18   : > { %3548 = vmatprep.subr.bf16.mxu1 %v3784_v17  ;;  %647 = vst [vmem:[#allocation2 + $0xc] sm:$0x8] %v646_v37  ;;  %653 = vst [vmem:[#allocation2 + $0x24] sm:$0x8] %v652_v41  ;;  %v658_v45 = vsel %vm4012_vm2, 0, %v657_v43  ;;  %v4064_v48 = vld [vmem:[%s4753_s2 + $0xb8] sm:$0xff]  }
  0x19   : > { %3525 = vmatpush3.bf16.msra.mxu0 %v3770_v3  ;;  %v675_v47 = vld [vmem:[#allocation2 + $0x14] sm:$0x1]  ;;  %656 = vst [vmem:[#allocation2 + $0x30] sm:$0x8] %v655_v44  ;;  %659 = vst [vmem:[#allocation2 + $0x3c] sm:$0x8] %v658_v45 }
  0x1a   : > { %3526 = vmatprep.subr.bf16.mxu0 %v3771_v5  ;;  %v642_v34 = vld [vmem:[#allocation2] sm:$0x8]  ;;  %v676_v50 = vsel %vm4022_vm5, 0, %v675_v47  ;;  %v660_v51 = vld [vmem:[#allocation2 + $0x48] sm:$0x8]  ;;  %v4083_v62 = vld [vmem:[%s4753_s2 + $0xf8] sm:$0xff]  }
  0x1b   : > { %3549 = vmatpush3.bf16.msra.mxu1 %v3784_v17  ;;  %v643_v36 = vsel %vm4012_vm2, 0, %v642_v34  ;;  %v672_v46 = vld [vmem:[#allocation2 + $0x8] sm:$0x1]  ;;  %677 = vst [vmem:[#allocation2 + $0x14] sm:$0x1] %v676_v50  ;;  %v661_v52 = vsel %vm4012_vm2, 0, %v660_v51 }
  0x1c   : > { %3550 = vmatprep.subr.bf16.mxu1 %v3786_v21  ;;  %644 = vst [vmem:[#allocation2] sm:$0x8] %v643_v36  ;;  %v673_v49 = vsel %vm4022_vm5, 0, %v672_v46  ;;  %v663_v53 = vld [vmem:[#allocation2 + $0x54] sm:$0x8]  ;;  %v3798_v57 = vld [vmem:[%s4753_s2] sm:$0xff]  }
  0x1d   : > { %3527 = vmatpush3.bf16.msra.mxu0 %v3771_v5  ;;  %674 = vst [vmem:[#allocation2 + $0x8] sm:$0x1] %v673_v49  ;;  %662 = vst [vmem:[#allocation2 + $0x48] sm:$0x8] %v661_v52  ;;  %v664_v55 = vsel %vm4012_vm2, 0, %v663_v53 }
  0x1e   : > { %3528 = vmatprep.subr.bf16.mxu0 %v3772_v6  ;;  %v678_v56 = vld [vmem:[#allocation2 + $0x20] sm:$0x1]  ;;  %665 = vst [vmem:[#allocation2 + $0x54] sm:$0x8] %v664_v55  ;;  %v681_v60 = vld [vmem:[#allocation2 + $0x2c] sm:$0x1] }
  0x1f   : > { %3551 = vmatpush3.bf16.msra.mxu1 %v3786_v21  ;;  %v679_v59 = vsel %vm4022_vm5, 0, %v678_v56  ;;  %v682_v0 = vsel %vm4022_vm5, 0, %v681_v60  ;;  %v687_v12 = vld [vmem:[#allocation2 + $0x44] sm:$0x1]  ;;  %v690_v15 = vld [vmem:[#allocation2 + $0x50] sm:$0x1] }
  0x20   : > { %3552 = vmatprep.subr.bf16.mxu1 %v3788_v27  ;;  %680 = vst [vmem:[#allocation2 + $0x20] sm:$0x1] %v679_v59  ;;  %683 = vst [vmem:[#allocation2 + $0x2c] sm:$0x1] %v682_v0  ;;  %v666_v21 = vld [vmem:[#allocation2 + $0x60] sm:$0x8] }
  0x21   : > { %3529 = vmatpush3.bf16.msra.mxu0 %v3772_v6  ;;  %v667_v24 = vsel %vm4012_vm2, 0, %v666_v21  ;;  %v696_v39 = vld [vmem:[#allocation2 + $0x68] sm:$0x1]  ;;  %v639_v56 = vld [vmem:[#allocation2 + $0x74] sm:$0x1] }
  0x22   : > { %3530 = vmatprep.subr.bf16.mxu0 %v3773_v7  ;;  %668 = vst [vmem:[#allocation2 + $0x60] sm:$0x8] %v667_v24  ;;  %v697_v43 = vsel %vm4022_vm5, 0, %v696_v39  ;;  %v640_v59 = vsel %vm4022_vm5, 0, %v639_v56 }
  0x23   : > { %3553 = vmatpush3.bf16.msra.mxu1 %v3788_v27  ;;  %698 = vst [vmem:[#allocation2 + $0x68] sm:$0x1] %v697_v43  ;;  %641 = vst [vmem:[#allocation2 + $0x74] sm:$0x1] %v640_v59  ;;  %v721_v59 = vld [vmem:[#allocation2 + $0xc] sm:$0x8] }
  0x24   : > { %3554 = vmatprep.subr.bf16.mxu1 %v3790_v29 }
  0x25   : > { %3531 = vmatpush3.bf16.msra.mxu0 %v3773_v7 }
  0x26   : > { %3532 = vmatprep.subr.bf16.mxu0 %v3774_v8 }
  0x27   : > { %3555 = vmatpush3.bf16.msra.mxu1 %v3790_v29 }
  0x28   : > { %3556 = vmatprep.subr.bf16.mxu1 %v3792_v31 }
  0x29   : > { %3533 = vmatpush3.bf16.msra.mxu0 %v3774_v8 }
  0x2a   : > { %3566 = vmatprep.subr.bf16.mxu0 %v3781_v14 }
  0x2b   : > { %3557 = vmatpush3.bf16.msra.mxu1 %v3792_v31  ;;  %v635_v31 = vld [vmem:[#allocation2 + $0x6c] sm:$0x8] }
  0x2c   : > { %3535 = vmatmul.mubr.bf16.vlgmr.msra.gmra.mxu0 %v3776_v9  ;;  %3590 = vmatprep.subr.bf16.mxu1 %v4064_v48  ;;  %v684_v9 = vld [vmem:[#allocation2 + $0x38] sm:$0x1]  ;;  %v636_v32 = vsel %vm4012_vm2, 0, %v635_v31 }
  0x2d   : > { %3538 = vmatprep.mubr.bf16.mxu0 %v3777_v10  ;;  %3567 = vmatpush3.bf16.msra.mxu0 %v3781_v14  ;;  %v688_v14 = vsel %vm4022_vm5, 0, %v687_v12  ;;  %637 = vst [vmem:[#allocation2 + $0x6c] sm:$0x8] %v636_v32 }
  0x2e   : > { %3568 = vmatprep.subr.bf16.mxu0 %v3783_v16  ;;  %689 = vst [vmem:[#allocation2 + $0x44] sm:$0x1] %v688_v14 }
  0x31   : > { %3569 = vmatpush3.bf16.msra.mxu0 %v3783_v16  ;;  %v693_v16 = vld [vmem:[#allocation2 + $0x5c] sm:$0x1] }
  0x32   : > { %3570 = vmatprep.subr.bf16.mxu0 %v3785_v18  ;;  %v694_v20 = vsel %vm4022_vm5, 0, %v693_v16 }
  0x33   : > { %695 = vst [vmem:[#allocation2 + $0x5c] sm:$0x1] %v694_v20 }
  0x34   : > { %3539 = vmatmul.mubr.bf16.gmra.mxu0 %v3778_v11  ;;  %v685_v11 = vsel %vm4022_vm5, 0, %v684_v9  ;;  %v669_v47 = vld [vmem:[#allocation2 + $0x6c] sm:$0x8] }
  0x35   : > { %3571 = vmatpush3.bf16.msra.mxu0 %v3785_v18  ;;  %686 = vst [vmem:[#allocation2 + $0x38] sm:$0x1] %v685_v11  ;;  %v691_v18 = vsel %vm4022_vm5, 0, %v690_v15  ;;  %v670_v52 = vsel %vm4012_vm2, 0, %v669_v47  ;;  %vm4227_vm2 = vmor %vm1156_vm7, %vm1157_vm8 }
  0x36   : > { %3572 = vmatprep.subr.bf16.mxu0 %v3787_v25  ;;  %692 = vst [vmem:[#allocation2 + $0x50] sm:$0x1] %v691_v18  ;;  %671 = vst [vmem:[#allocation2 + $0x6c] sm:$0x8] %v670_v52  ;;  %v3114_v18 = vld [vmem:[%s4755_s4] ss:$0 sm:$0xff] }
  0x39   : > { %3573 = vmatpush3.bf16.msra.mxu0 %v3787_v25 }
  0x3a   : > { %3574 = vmatprep.subr.bf16.mxu0 %v3789_v28 }
  0x3d   : > { %3575 = vmatpush3.bf16.msra.mxu0 %v3789_v28 }
  0x3e   : > { %3576 = vmatprep.subr.bf16.mxu0 %v3791_v30 }
  0x41   : > { %3577 = vmatpush3.bf16.msra.mxu0 %v3791_v30 }
  0x42   : > { %3578 = vmatprep.subr.bf16.mxu0 %v3793_v33 }
  0x45   : > { %3579 = vmatpush3.bf16.msra.mxu0 %v3793_v33 }
  0x46   : > { %3580 = vmatprep.subr.bf16.mxu0 %v3798_v57 }
  0x49   : > { %3581 = vmatpush3.bf16.msra.mxu0 %v3798_v57 }
  0x4a   : > { %3614 = vmatprep.subr.bf16.mxu0 %v4083_v62 }
  0xec   : > { %v3536_v54 = vpop.f32.mrf.mxu0 }
  0xee   : > { %v450_v58 = vpop.f32.mrf.mxu0 }
  0xf0   : > { %v3537_v61 = vpop.f32.mrf.mxu0 }
  0xf2   : > { %v453_v63 = vpop.f32.mrf.mxu0 }
  0xf3   : > { %v481_v1 = vadd.f32 %v453_v63, %v450_v58 }
  0xf4   : > { %v3540_v2 = vpop.f32.mrf.mxu0 }
  0xf5   : > { %v482_v3 = vadd.f32 %v3536_v54, %v481_v1 }
  0xf6   : > { %v466_v4 = vpop.f32.mrf.mxu0 }
  0xf7   : > { %v483_v5 = vadd.f32 %v3537_v61, %v482_v3 }
  0xf8   : > { %v3541_v6 = vpop.f32.mrf.mxu0 }
  0xf9   : > { %v484_v7 = vadd.f32 %v483_v5, %v466_v4 }
  0xfa   : > { %v469_v8 = vpop.f32.mrf.mxu0 }
  0xfb   : > { %v485_v10 = vadd.f32 %v484_v7, %v469_v8 }
  0xfd   : > { %v486_v13 = vadd.f32 %v3540_v2, %v485_v10  ;;  %v3113_v10 = vld [vmem:[%s4754_s3] ss:$0 sm:$0xff] }
  0xff   : > { %v487_v17 = vadd.f32 %v3541_v6, %v486_v13 }
 0x101   : > { %v488_v22 = vrot.slane %v487_v17, 4 }
 0x103   : > { %v489_v25 = vadd.f32 %v488_v22, %v487_v17 }
 0x105   : > { %v490_v26 = vrot.slane %v489_v25, 2 }
 0x107   : > { %v491_v27 = vadd.f32 %v490_v26, %v489_v25 }
 0x109   : > { %v492_v28 = vrot.slane %v491_v27, 1 }
 0x10b   : > { %v493_v29 = vadd.f32 %v492_v28, %v491_v27 }
 0x10d   : > { %v494_v30 = vmul.f32 0.015625, %v493_v29 }
 0x10f   : > { %v495_v33 = vsub.f32 %v450_v58, %v494_v30  ;;  %v496_v34 = vsub.f32 %v453_v63, %v494_v30  ;;  %v497_v35 = vsub.f32 %v3536_v54, %v494_v30  ;;  %v498_v36 = vsub.f32 %v3537_v61, %v494_v30 }
 0x110   : > { %v499_v40 = vsub.f32 %v466_v4, %v494_v30  ;;  %v500_v44 = vsub.f32 %v469_v8, %v494_v30  ;;  %v501_v49 = vsub.f32 %v3540_v2, %v494_v30  ;;  %v502_v53 = vsub.f32 %v3541_v6, %v494_v30  ;;  %v699_v2 = vld [vmem:[#allocation2 + $0x74] sm:$0x1] }
 0x111   : > { %v503_v37 = vmul.f32 %v495_v33, %v495_v33  ;;  %v504_v38 = vmul.f32 %v496_v34, %v496_v34  ;;  %v505_v41 = vmul.f32 %v497_v35, %v497_v35  ;;  %v506_v45 = vmul.f32 %v498_v36, %v498_v36 }
 0x112   : > { %v507_v50 = vmul.f32 %v499_v40, %v499_v40  ;;  %v508_v54 = vmul.f32 %v500_v44, %v500_v44  ;;  %v509_v57 = vmul.f32 %v501_v49, %v501_v49  ;;  %v510_v60 = vmul.f32 %v502_v53, %v502_v53 }
 0x113   : > { %v511_v42 = vadd.f32 %v504_v38, %v503_v37  ;;  %v700_v19 = vsel %vm4022_vm5, 0, %v699_v2 }
 0x114   : > { %701 = vst [vmem:[#allocation2 + $0x74] sm:$0x1] %v700_v19 }
 0x115   : > { %v512_v46 = vadd.f32 %v511_v42, %v505_v41 }
 0x117   : > { %v513_v51 = vadd.f32 %v512_v46, %v506_v45 }
 0x119   : > { %v514_v55 = vadd.f32 %v513_v51, %v507_v50 }
 0x11b   : > { %v515_v58 = vadd.f32 %v514_v55, %v508_v54 }
 0x11d   : > { %v516_v61 = vadd.f32 %v515_v58, %v509_v57  ;;  %v719_v58 = vld [vmem:[#allocation2] sm:$0x8] }
 0x11e   : > { %v738_v19 = vshrl.u32 %v719_v58, 16 }
 0x11f   : > { %v517_v63 = vadd.f32 %v516_v61, %v510_v60  ;;  %v723_v61 = vld [vmem:[#allocation2 + $0x18] sm:$0x8] }
 0x121   : > { %v518_v0 = vrot.slane %v517_v63, 4 }
 0x123   : > { %v519_v1 = vadd.f32 %v518_v0, %v517_v63  ;;  %v725_v63 = vld [vmem:[#allocation2 + $0x24] sm:$0x8]  ;;  %v727_v0 = vld [vmem:[#allocation2 + $0x30] sm:$0x8] }
 0x125   : > { %v520_v3 = vrot.slane %v519_v1, 2 }
 0x127   : > { %v521_v4 = vadd.f32 %v520_v3, %v519_v1  ;;  %v751_v3 = vshrl.u32 %v721_v59, 16 }
 0x129   : > { %v522_v5 = vrot.slane %v521_v4, 1 }
 0x12b   : > { %v523_v6 = vadd.f32 %v522_v5, %v521_v4  ;;  %v729_v4 = vld [vmem:[#allocation2 + $0x3c] sm:$0x8]  ;;  %v764_v5 = vshrl.u32 %v723_v61, 16 }
 0x12d   : > { %v524_v7 = vmul.f32 0.015625, %v523_v6  ;;  %v1141_v6 = vld [vmem:[#allocation2 + $0x8] sm:$0x1] }
 0x12f   : > { %v525_v8 = vadd.f32 1e-05, %v524_v7  ;;  %v777_v7 = vshrl.u32 %v725_v63, 16 }
 0x131   : > { %3863 = vrsqrt.f32 %v525_v8  ;;  %v790_v8 = vshrl.u32 %v727_v0, 16 }
 0x13e   : > { %v3864_v9 = vpop.eup %3863 }
 0x13f   : > { %v527_v11 = vmul.f32 %v3864_v9, %v495_v33  ;;  %v528_v12 = vmul.f32 %v3864_v9, %v496_v34  ;;  %v529_v13 = vmul.f32 %v3864_v9, %v497_v35  ;;  %v530_v14 = vmul.f32 %v3864_v9, %v498_v36 }
 0x140   : > { %v531_v15 = vmul.f32 %v3864_v9, %v499_v40  ;;  %v532_v23 = vmul.f32 %v3864_v9, %v500_v44  ;;  %v533_v16 = vmul.f32 %v3864_v9, %v501_v49  ;;  %v534_v17 = vmul.f32 %v3864_v9, %v502_v53  ;;  %v1140_v44 = vld [vmem:[#allocation2 + $0x4] sm:$0xf]  ;;  %v1143_v9 = vld [vmem:[#allocation2 + $0x14] sm:$0x1] }
 0x141   : > { %v542_v20 = vmul.f32 %v3113_v10, %v527_v11  ;;  %v543_v21 = vmul.f32 %v3113_v10, %v528_v12  ;;  %v544_v22 = vmul.f32 %v3113_v10, %v529_v13  ;;  %v545_v24 = vmul.f32 %v3113_v10, %v530_v14  ;;  %v4138_v53 = vld [vmem:[#allocation2 + $0x4] sm:$0xf] }
 0x142   : > { %v546_v25 = vmul.f32 %v3113_v10, %v531_v15  ;;  %v547_v26 = vmul.f32 %v3113_v10, %v532_v23  ;;  %v548_v27 = vmul.f32 %v3113_v10, %v533_v16  ;;  %v549_v28 = vmul.f32 %v3113_v10, %v534_v17 }
 0x143   : > { %v4114_v29 = vadd.f32 %v3114_v18, %v542_v20  ;;  %v4116_v30 = vadd.f32 %v3114_v18, %v543_v21  ;;  %v4118_v31 = vadd.f32 %v3114_v18, %v544_v22  ;;  %v4120_v32 = vadd.f32 %v3114_v18, %v545_v24  ;;  %v4151_v20 = vld [vmem:[#allocation2 + $0x54] sm:$0x8]  ;;  %v4157_v24 = vld [vmem:[#allocation2 + $0xc] sm:$0x8] }
 0x144   : > { %v4122_v33 = vadd.f32 %v3114_v18, %v546_v25  ;;  %v4124_v34 = vadd.f32 %v3114_v18, %v547_v26  ;;  %v4126_v35 = vadd.f32 %v3114_v18, %v548_v27  ;;  %v4128_v36 = vadd.f32 %v3114_v18, %v549_v28  ;;  %v4149_v18 = vld [vmem:[#allocation2 + $0x48] sm:$0x8] }
 0x145   : > { %v573_v37 = vmin.f32 %v4114_v29, 0.0  ;;  %v574_v38 = vmin.f32 %v4116_v30, 0.0  ;;  %v575_v39 = vmin.f32 %v4118_v31, 0.0  ;;  %v576_v40 = vmin.f32 %v4120_v32, 0.0 }
 0x146   : > { %v577_v41 = vmin.f32 %v4122_v33, 0.0  ;;  %v578_v42 = vmin.f32 %v4124_v34, 0.0  ;;  %v579_v43 = vmin.f32 %v4126_v35, 0.0  ;;  %v580_v49 = vmin.f32 %v4128_v36, 0.0 }
 0x147   : > { %v581_v45 = vmul.f32 1.442695, %v573_v37  ;;  %v583_v46 = vmul.f32 1.442695, %v574_v38  ;;  %v585_v47 = vmul.f32 1.442695, %v575_v39 }
 0x148   : > { %v587_v50 = vmul.f32 1.442695, %v576_v40  ;;  %v589_v51 = vmul.f32 1.442695, %v577_v41  ;;  %v591_v52 = vmul.f32 1.442695, %v578_v42 }
 0x149   : > { %3865 = vpow2.f32 %v581_v45  ;;  %v1160_v54 = vshrl.u32 %v1140_v44, 16  ;;  %v1163_v55 = vshll.u32 %v1140_v44, 16  ;;  %v593_v56 = vmul.f32 1.442695, %v579_v43  ;;  %v4165_v37 = vld [vmem:[#allocation2 + $0x18] sm:$0x8] }
 0x14a   : > { %3867 = vpow2.f32 %v583_v46  ;;  %v595_v57 = vmul.f32 1.442695, %v580_v49  ;;  %v743_v60 = vshrl.u32 %v4138_v53, 16  ;;  %v746_v11 = vshll.u32 %v4138_v53, 16 }
 0x14b   : > { %3869 = vpow2.f32 %v585_v47  ;;  %v1162_v1 = vrot.slane %v1160_v54, 4  ;;  %v1165_v2 = vrot.slane %v1163_v55, 5  ;;  %v803_v12 = vshrl.u32 %v729_v4, 16 }
 0x14c   : > { %3871 = vpow2.f32 %v587_v50  ;;  %v745_v10 = vrot.slane %v743_v60, 7  ;;  %v4143_v14 = vrot.slane %v738_v19, 11  ;;  %v4145_v15 = vrot.slane %v751_v3, 11  ;;  %v4197_v19 = vld [vmem:[#allocation2 + $0x20] sm:$0x1] }
 0x14d   : > { %3873 = vpow2.f32 %v589_v51  ;;  %v1166_v13 = vor.u32 %v1165_v2, %v1162_v1  ;;  %v1169_v23 = vshll.u32 %v1141_v6, 16  ;;  %v4147_v16 = vrot.slane %v764_v5, 11  ;;  %v4199_v3 = vld [vmem:[#allocation2 + $0x2c] sm:$0x1]  ;;  %v4204_v6 = vld [vmem:[#allocation2 + $0x24] sm:$0x8] }
 0x14e   : > { %3875 = vpow2.f32 %v591_v52  ;;  %v1183_v17 = vshll.u32 %v1143_v9, 16  ;;  %v4153_v21 = vrot.slane %v777_v7, 11  ;;  %v4155_v22 = vrot.slane %v790_v8, 11 }
 0x14f   : > { %3877 = vpow2.f32 %v593_v56  ;;  %v4159_v26 = vor.u32 %v746_v11, %v745_v10  ;;  %v4161_v27 = vrot.slane %v803_v12, 11  ;;  %v4163_v28 = vrot.slane %v1166_v13, 4  ;;  %v4219_v10 = vld [vmem:[#allocation2 + $0x38] sm:$0x1]  ;;  %v4221_v11 = vld [vmem:[#allocation2 + $0x3c] sm:$0x8] }
 0x150   : > { %3879 = vpow2.f32 %v595_v57  ;;  %v4174_v40 = vrot.slane %v1169_v23, 5  ;;  %v816_v41 = vshrl.u32 %v4149_v18, 16  ;;  %v829_v42 = vshrl.u32 %v4151_v20, 16 }
 0x151   : > { %vm565_vm9 = vcmp.gt.f32.partialorder %v4114_v29, 0.0  ;;  %v4179_v45 = vrot.slane %v1183_v17, 5  ;;  %v1442_v46 = vshrl.u32 %v4157_v24, 16  ;;  %vm566_vm10 = vcmp.gt.f32.partialorder %v4116_v30, 0.0 }
 0x152   : > { %v1455_v51 = vshrl.u32 %v4165_v37, 16  ;;  %vm567_vm11 = vcmp.gt.f32.partialorder %v4118_v31, 0.0  ;;  %vm568_vm12 = vcmp.gt.f32.partialorder %v4120_v32, 0.0  ;;  %vm569_vm13 = vcmp.gt.f32.partialorder %v4122_v33, 0.0 }
 0x153   : > { %vm570_vm14 = vcmp.gt.f32.partialorder %v4124_v34, 0.0  ;;  %vm571_vm15 = vcmp.gt.f32.partialorder %v4126_v35, 0.0  ;;  %vm572_vm0 = vcmp.gt.f32.partialorder %v4128_v36, 0.0  ;;  %v4217_v9 = vrot.slane %v816_v41, 11 }
 0x154   : > { %v4231_v23 = vrot.slane %v829_v42, 11  ;;  %v1197_v17 = vshll.u32 %v4197_v19, 16  ;;  %v4235_v20 = vrot.slane %v1442_v46, 11  ;;  %v4237_v24 = vrot.slane %v1455_v51, 11 }
 0x155   : > { %v1468_v37 = vshrl.u32 %v4204_v6, 16  ;;  %v749_v42 = vsel %vm4213_vm1, %v4143_v14, %v4159_v26 }
 0x156   : > { %v3866_v25 = vpop.eup %3865 }
 0x157   : > { %v3868_v38 = vpop.eup %3867  ;;  %v3115_v39 = vadd.f32 -1.0, %v3866_v25  ;;  %v1225_v25 = vshll.u32 %v4219_v10, 16  ;;  %v4339_v19 = vrot.slane %v1468_v37, 11 }
 0x158   : > { %v3870_v43 = vpop.eup %3869  ;;  %v3116_v44 = vadd.f32 -1.0, %v3868_v38 }
 0x159   : > { %v3872_v47 = vpop.eup %3871  ;;  %v3117_v49 = vadd.f32 -1.0, %v3870_v43  ;;  %v605_v50 = vsel %vm565_vm9, %v4114_v29, %v3115_v39  ;;  %v1494_v39 = vshrl.u32 %v4221_v11, 16  ;;  %v4348_v6 = vrot.slane %v1225_v25, 5  ;;  %v3811_v11 = vld [vmem:[%s4753_s2 + $0xd0] sm:$0xff]  }
 0x15a   : > { %v3874_v52 = vpop.eup %3873  ;;  %v3118_v54 = vadd.f32 -1.0, %v3872_v47  ;;  %v606_v55 = vsel %vm566_vm10, %v4116_v30, %v3116_v44  ;;  %613 = vst [vmem:[%s4172_s10] sm:$0xff] %v605_v50  ;;  %v702_v56 = vpack.c.bf16 %v605_v50, %v605_v50  ;;  %v1172_v44 = vsel %vm4227_vm2, %v4163_v28, %v4174_v40  ;;  %v3808_v40 = vld [vmem:[%s4753_s2 + $0x90] sm:$0xff]  }
 0x15b   : > { %v3876_v57 = vpop.eup %3875  ;;  %v3119_v58 = vadd.f32 -1.0, %v3874_v52  ;;  %v607_v59 = vsel %vm567_vm11, %v4118_v31, %v3117_v49  ;;  %614 = vst [vmem:[%s4172_s10 + $0x8] sm:$0xff] %v606_v55  ;;  %v703_v29 = vpack.c.bf16 %v606_v55, %v606_v55 }
 0x15c   : > { %v3878_v60 = vpop.eup %3877  ;;  %v3120_v61 = vadd.f32 -1.0, %v3876_v57  ;;  %v608_v63 = vsel %vm568_vm12, %v4120_v32, %v3118_v54  ;;  %615 = vst [vmem:[%s4172_s10 + $0x10] sm:$0xff] %v607_v59  ;;  %v704_v30 = vpack.c.bf16 %v607_v59, %v607_v59  ;;  %711 = vst [vmem:[#allocation2 + $0x10] sm:$0xf] %v702_v56 }
 0x15d   : > { %v3880_v0 = vpop.eup %3879  ;;  %v3121_v1 = vadd.f32 -1.0, %v3878_v60  ;;  %v609_v2 = vsel %vm569_vm13, %v4122_v33, %v3119_v58  ;;  %616 = vst [vmem:[%s4172_s10 + $0x18] sm:$0xff] %v608_v63  ;;  %v705_v31 = vpack.c.bf16 %v608_v63, %v608_v63  ;;  %712 = vst [vmem:[#allocation2 + $0x1c] sm:$0xf] %v703_v29  ;;  %v4206_v33 = vld [vmem:[#allocation2 + $0x30] sm:$0x8] }
 0x15e   : > { %v3122_v32 = vadd.f32 -1.0, %v3880_v0  ;;  %v610_v4 = vsel %vm570_vm14, %v4124_v34, %v3120_v61  ;;  %617 = vst [vmem:[%s4172_s10 + $0x20] sm:$0xff] %v609_v2  ;;  %v706_v5 = vpack.c.bf16 %v609_v2, %v609_v2  ;;  %713 = vst [vmem:[#allocation2 + $0x28] sm:$0xf] %v704_v30  ;;  %v1481_v38 = vshrl.u32 %v4206_v33, 16  ;;  %v3799_v61 = vld [vmem:[%s4753_s2 + $0xb0] sm:$0xff]  }
 0x15f   : > { %v611_v7 = vsel %vm571_vm15, %v4126_v35, %v3121_v1  ;;  %618 = vst [vmem:[%s4172_s10 + $0x28] sm:$0xff] %v610_v4  ;;  %v707_v8 = vpack.c.bf16 %v610_v4, %v610_v4  ;;  %714 = vst [vmem:[#allocation2 + $0x34] sm:$0xf] %v705_v31  ;;  %v3857_v34 = vld [vmem:[%s4753_s2 + $0x220] sm:$0xff]  }
 0x160   : > { %v612_v12 = vsel %vm572_vm0, %v4128_v36, %v3122_v32  ;;  %619 = vst [vmem:[%s4172_s10 + $0x30] sm:$0xff] %v611_v7  ;;  %v708_v13 = vpack.c.bf16 %v611_v7, %v611_v7  ;;  %715 = vst [vmem:[#allocation2 + $0x40] sm:$0xf] %v706_v5  ;;  %v1211_v36 = vshll.u32 %v4199_v3, 16  ;;  %v4352_v37 = vrot.slane %v1481_v38, 11 }
 0x161   : > { %620 = vst [vmem:[%s4172_s10 + $0x38] sm:$0xff] %v612_v12  ;;  %v709_v18 = vpack.c.bf16 %v612_v12, %v612_v12  ;;  %716 = vst [vmem:[#allocation2 + $0x4c] sm:$0xf] %v707_v8 }
 0x162   : > { %717 = vst [vmem:[#allocation2 + $0x58] sm:$0xf] %v708_v13 }
 0x163   : > { %718 = vst [vmem:[#allocation2 + $0x64] sm:$0xf] %v709_v18  ;;  %v722_v41 = vld [vmem:[#allocation2 + $0x10] sm:$0xf] }
 0x164   : > { %v1142_v43 = vld [vmem:[#allocation2 + $0x10] sm:$0xf]  ;;  %v756_v47 = vshrl.u32 %v722_v41, 16  ;;  %v759_v49 = vshll.u32 %v722_v41, 16  ;;  %v3147_v50 = vcombine.low %v4138_v53, %v722_v41  ;;  %v724_v51 = vld [vmem:[#allocation2 + $0x1c] sm:$0xf] }
 0x165   : > { %v4252_v46 = vld [vmem:[#allocation2 + $0x10] sm:$0xf]  ;;  %v1174_v52 = vshrl.u32 %v1142_v43, 16  ;;  %v726_v54 = vld [vmem:[#allocation2 + $0x28] sm:$0xf]  ;;  %v769_v55 = vshrl.u32 %v724_v51, 16 }
 0x166   : > { %v772_v56 = vshll.u32 %v724_v51, 16  ;;  %v1177_v57 = vshll.u32 %v1142_v43, 16  ;;  %v1447_v14 = vshrl.u32 %v4252_v46, 16  ;;  %v758_v26 = vrot.slane %v756_v47, 7  ;;  %3558 = vmatprep.mubr.bf16.mxu1 %v3147_v50  ;;  %v728_v60 = vld [vmem:[#allocation2 + $0x34] sm:$0xf] }
 0x167   : > { %v782_v58 = vshrl.u32 %v726_v54, 16  ;;  %v785_v59 = vshll.u32 %v726_v54, 16  ;;  %v3148_v29 = vcombine.low %v724_v51, %v726_v54  ;;  %v771_v63 = vrot.slane %v769_v55, 7  ;;  %v730_v53 = vld [vmem:[#allocation2 + $0x40] sm:$0xf] }
 0x168   : > { %v795_v30 = vshrl.u32 %v728_v60, 16  ;;  %v798_v0 = vshll.u32 %v728_v60, 16  ;;  %v1176_v1 = vrot.slane %v1174_v52, 4  ;;  %v761_v2 = vor.u32 %v759_v49, %v758_v26  ;;  %v732_v5 = vld [vmem:[#allocation2 + $0x4c] sm:$0xf] }
 0x169   : > { %v784_v31 = vrot.slane %v782_v58, 7  ;;  %3559 = vmatmul.mubr.bf16.vlgmr.msra.gmra.mxu1 %v3148_v29  ;;  %v808_v32 = vshrl.u32 %v730_v53, 16  ;;  %v811_v4 = vshll.u32 %v730_v53, 16  ;;  %v774_v7 = vor.u32 %v772_v56, %v771_v63  ;;  %v734_v13 = vld [vmem:[#allocation2 + $0x58] sm:$0xf]  ;;  %v3801_v49 = vld [vmem:[%s4753_s2 + $0xa8] sm:$0xff]  }
 0x16a   : > { %3591 = vmatpush3.bf16.msra.mxu1 %v4064_v48  ;;  %v797_v8 = vrot.slane %v795_v30, 7  ;;  %v3149_v12 = vcombine.low %v728_v60, %v730_v53  ;;  %v821_v18 = vshrl.u32 %v732_v5, 16  ;;  %v762_v47 = vsel %vm4213_vm1, %v4145_v15, %v761_v2  ;;  %v4272_v58 = vld [vmem:[#allocation2 + $0x1c] sm:$0xf]  ;;  %v3804_v63 = vld [vmem:[%s4753_s2 + $0xa0] sm:$0xff]  }
 0x16b   : > { %v787_v41 = vor.u32 %v785_v59, %v784_v31  ;;  %v810_v43 = vrot.slane %v808_v32, 7  ;;  %3592 = vmatprep.subr.bf16.mxu1 %v3799_v61  ;;  %v824_v50 = vshll.u32 %v732_v5, 16  ;;  %v3159_v51 = vcombine.low %v749_v42, %v762_v47  ;;  %v1152_v3 = vld [vmem:[#allocation2 + $0x4c] sm:$0xf]  ;;  %v4361_v38 = vld [vmem:[#allocation2 + $0x40] sm:$0xf] }
 0x16c   : > { %3562 = vmatprep.mubr.bf16.mxu1 %v3149_v12  ;;  %v775_v48 = vsel %vm4213_vm1, %v4147_v16, %v774_v7  ;;  %v823_v52 = vrot.slane %v821_v18, 7  ;;  %v834_v54 = vshrl.u32 %v734_v13, 16  ;;  %v837_v56 = vshll.u32 %v734_v13, 16  ;;  %v3803_v16 = vld [vmem:[%s4753_s2 + $0xf0] sm:$0xff]   ;;  %v3806_v18 = vld [vmem:[%s4753_s2 + $0x98] sm:$0xff]  }
 0x16d   : > { %v788_v55 = vsel %vm4213_vm1, %v4153_v21, %v787_v41  ;;  %v3150_v26 = vcombine.low %v732_v5, %v734_v13  ;;  %v800_v15 = vor.u32 %v798_v0, %v797_v8  ;;  %3582 = vmatprep.mubr.bf16.mxu0 %v3159_v51  ;;  %v813_v42 = vor.u32 %v811_v4, %v810_v43  ;;  %v1144_v0 = vld [vmem:[#allocation2 + $0x1c] sm:$0xf]  ;;  %v1146_v4 = vld [vmem:[#allocation2 + $0x28] sm:$0xf]  ;;  %v1148_v13 = vld [vmem:[#allocation2 + $0x34] sm:$0xf] }
 0x16e   : > { %3593 = vmatpush3.bf16.msra.mxu1 %v3799_v61  ;;  %v3160_v59 = vcombine.low %v775_v48, %v788_v55  ;;  %v836_v29 = vrot.slane %v834_v54, 7  ;;  %v1179_v60 = vrot.slane %v1177_v57, 5  ;;  %v826_v53 = vor.u32 %v824_v50, %v823_v52 }
 0x16f   : > { %3594 = vmatprep.subr.bf16.mxu1 %v3801_v49  ;;  %v801_v21 = vsel %vm4213_vm1, %v4155_v22, %v800_v15  ;;  %v1449_v61 = vrot.slane %v1447_v14, 7  ;;  %v1450_v30 = vshll.u32 %v4252_v46, 16  ;;  %v814_v57 = vsel %vm4213_vm1, %v4161_v27, %v813_v42  ;;  %v3805_v27 = vld [vmem:[%s4753_s2 + $0xe8] sm:$0xff]  }
 0x170   : > { %3583 = vmatmul.mubr.bf16.vlgmr.msra.gmra.mxu0 %v3160_v59  ;;  %v1180_v2 = vor.u32 %v1179_v60, %v1176_v1  ;;  %v839_v31 = vor.u32 %v837_v56, %v836_v29  ;;  %v1460_v32 = vshrl.u32 %v4272_v58, 16  ;;  %v3161_v22 = vcombine.low %v801_v21, %v814_v57  ;;  %v4330_v60 = vld [vmem:[#allocation2 + $0x48] sm:$0x8] }
 0x171   : > { %3615 = vmatpush3.bf16.msra.mxu0 %v4083_v62  ;;  %3563 = vmatmul.mubr.bf16.gmra.mxu1 %v3150_v26  ;;  %v827_v14 = vsel %vm4213_vm1, %v4217_v9, %v826_v53  ;;  %v1452_v5 = vor.u32 %v1450_v30, %v1449_v61  ;;  %v1463_v7 = vshll.u32 %v4272_v58, 16  ;;  %v1188_v12 = vshrl.u32 %v1144_v0, 16  ;;  %v3807_v26 = vld [vmem:[%s4753_s2 + $0xe0] sm:$0xff]   ;;  %v4335_v61 = vld [vmem:[#allocation2 + $0x28] sm:$0xf] }
 0x172   : > { %3595 = vmatpush3.bf16.msra.mxu1 %v3801_v49  ;;  %v1181_v8 = vrot.slane %v1180_v2, 4  ;;  %3616 = vmatprep.subr.bf16.mxu0 %v3803_v16  ;;  %v840_v62 = vsel %vm4213_vm1, %v4231_v23, %v839_v31  ;;  %v1462_v1 = vrot.slane %v1460_v32, 7  ;;  %v1191_v43 = vshll.u32 %v1144_v0, 16  ;;  %v1150_v49 = vld [vmem:[#allocation2 + $0x40] sm:$0xf] }
 0x173   : > { %3586 = vmatprep.mubr.bf16.mxu0 %v3161_v22  ;;  %3596 = vmatprep.subr.bf16.mxu1 %v3804_v63  ;;  %v3162_v9 = vcombine.low %v827_v14, %v840_v62  ;;  %v1453_v41 = vsel %vm4213_vm1, %v4235_v20, %v1452_v5  ;;  %v1202_v47 = vshrl.u32 %v1146_v4, 16  ;;  %v1190_v51 = vrot.slane %v1188_v12, 4  ;;  %v1151_v20 = vld [vmem:[#allocation2 + $0x44] sm:$0x1]  ;;  %v4344_v2 = vld [vmem:[#allocation2 + $0x34] sm:$0xf] }
 0x174   : > { %v1186_v23 = vsel %vm4227_vm2, %v1181_v8, %v4179_v45  ;;  %v1465_v50 = vor.u32 %v1463_v7, %v1462_v1  ;;  %v1205_v48 = vshll.u32 %v1146_v4, 16  ;;  %v1193_v54 = vrot.slane %v1191_v43, 5  ;;  %v1153_v31 = vld [vmem:[#allocation2 + $0x50] sm:$0x1]  ;;  %v1154_v14 = vld [vmem:[#allocation2 + $0x58] sm:$0xf] }
 0x175   : > { %v3187_v52 = vcombine.low %v1172_v44, %v1186_v23  ;;  %3617 = vmatpush3.bf16.msra.mxu0 %v3803_v16  ;;  %v1204_v55 = vrot.slane %v1202_v47, 4  ;;  %v1216_v56 = vshrl.u32 %v1148_v13, 16  ;;  %v1219_v59 = vshll.u32 %v1148_v13, 16  ;;  %v3809_v16 = vld [vmem:[%s4753_s2 + $0xd8] sm:$0xff]   ;;  %v4371_v43 = vld [vmem:[#allocation2 + $0x4c] sm:$0xf] }
 0x176   : > { %3597 = vmatpush3.bf16.msra.mxu1 %v3804_v63  ;;  %3618 = vmatprep.subr.bf16.mxu0 %v3805_v27  ;;  %v1466_v45 = vsel %vm4213_vm1, %v4237_v24, %v1465_v50  ;;  %v1207_v15 = vrot.slane %v1205_v48, 5  ;;  %v1230_v29 = vshrl.u32 %v1150_v49, 16  ;;  %v4324_v44 = vrot.slane %v1197_v17, 5  ;;  %v3810_v17 = vld [vmem:[%s4753_s2 + $0x88] sm:$0xff]   ;;  %v1155_v5 = vld [vmem:[#allocation2 + $0x5c] sm:$0x1] }
 0x177   : > { %3606 = vmatprep.mubr.bf16.mxu1 %v3187_v52  ;;  %3598 = vmatprep.subr.bf16.mxu1 %v3806_v18  ;;  %v3223_v28 = vcombine.low %v1453_v41, %v1466_v45  ;;  %v4328_v24 = vrot.slane %v1211_v36, 5  ;;  %v1233_v42 = vshll.u32 %v1150_v49, 16  ;;  %v1194_v21 = vor.u32 %v1193_v54, %v1190_v51  ;;  %v4375_v51 = vld [vmem:[#allocation2 + $0x54] sm:$0x8] }
 0x178   : > { %3587 = vmatmul.mubr.bf16.gmra.mxu0 %v3162_v9  ;;  %v1208_v63 = vor.u32 %v1207_v15, %v1204_v55  ;;  %v1239_v53 = vshll.u32 %v1151_v20, 16  ;;  %v1218_v36 = vrot.slane %v1216_v56, 4  ;;  %v1221_v30 = vrot.slane %v1219_v59, 5  ;;  %v3813_v15 = vld [vmem:[%s4753_s2 + $0xc8] sm:$0xff]  }
 0x179   : > { %3619 = vmatpush3.bf16.msra.mxu0 %v3805_v27  ;;  %3630 = vmatprep.mubr.bf16.mxu0 %v3223_v28  ;;  %v1232_v0 = vrot.slane %v1230_v29, 4  ;;  %v1235_v57 = vrot.slane %v1233_v42, 5  ;;  %v4356_v32 = vrot.slane %v1494_v39, 11  ;;  %v1507_v4 = vshrl.u32 %v4330_v60, 16  ;;  %v3812_v39 = vld [vmem:[%s4753_s2 + $0x80] sm:$0xff]  }
 0x17a   : > { %3599 = vmatpush3.bf16.msra.mxu1 %v3806_v18  ;;  %3620 = vmatprep.subr.bf16.mxu0 %v3807_v26  ;;  %v1473_v22 = vshrl.u32 %v4335_v61, 16  ;;  %v1244_v7 = vshrl.u32 %v1152_v3, 16  ;;  %v1195_v10 = vrot.slane %v1194_v21, 4  ;;  %v1209_v25 = vrot.slane %v1208_v63, 4  ;;  %v1863_v63 = vld [vmem:[#allocation2 + $0x1c] sm:$0xf] }
 0x17b   : > { %3600 = vmatprep.subr.bf16.mxu1 %v3808_v40  ;;  %v1486_v8 = vshrl.u32 %v4344_v2, 16  ;;  %v1247_v33 = vshll.u32 %v1152_v3, 16  ;;  %v1222_v27 = vor.u32 %v1221_v30, %v1218_v36  ;;  %v1236_v62 = vor.u32 %v1235_v57, %v1232_v0  ;;  %v4400_v30 = vld [vmem:[#allocation2 + $0x58] sm:$0xf]  ;;  %v4402_v0 = vld [vmem:[#allocation2 + $0x64] sm:$0xf] }
 0x17c   : > { %v4369_v1 = vrot.slane %v1239_v53, 5  ;;  %v1253_v12 = vshll.u32 %v1153_v31, 16  ;;  %v1246_v13 = vrot.slane %v1244_v7, 4  ;;  %v1258_v18 = vshrl.u32 %v1154_v14, 16 }
 0x17d   : > { %3621 = vmatpush3.bf16.msra.mxu0 %v3807_v26  ;;  %v1249_v9 = vrot.slane %v1247_v33, 5  ;;  %v1267_v41 = vshll.u32 %v1155_v5, 16  ;;  %v1475_v47 = vrot.slane %v1473_v22, 7  ;;  %v1476_v49 = vshll.u32 %v4335_v61, 16  ;;  %v1439_v22 = vld [vmem:[#allocation2 + $0x60] sm:$0x8] }
 0x17e   : > { %3601 = vmatpush3.bf16.msra.mxu1 %v3808_v40  ;;  %3622 = vmatprep.subr.bf16.mxu0 %v3809_v16  ;;  %v1261_v23 = vshll.u32 %v1154_v14, 16  ;;  %v1499_v50 = vshrl.u32 %v4361_v38, 16  ;;  %v1200_v48 = vsel %vm4227_vm2, %v1195_v10, %v4324_v44  ;;  %v1214_v52 = vsel %vm4227_vm2, %v1209_v25, %v4328_v24  ;;  %v1861_v44 = vld [vmem:[#allocation2 + $0x10] sm:$0xf]  ;;  %v3814_v24 = vld [vmem:[%s4753_s2 + $0x138] sm:$0xff]  }
 0x17f   : > { %3602 = vmatprep.subr.bf16.mxu1 %v3810_v17  ;;  %v1488_v54 = vrot.slane %v1486_v8, 7  ;;  %v1260_v55 = vrot.slane %v1258_v18, 4  ;;  %v1223_v20 = vrot.slane %v1222_v27, 4  ;;  %v1237_v56 = vrot.slane %v1236_v62, 4  ;;  %v1862_v14 = vld [vmem:[#allocation2 + $0x14] sm:$0x1] }
 0x180   : > { %v1263_v45 = vrot.slane %v1261_v23, 5  ;;  %v1512_v26 = vshrl.u32 %v4371_v43, 16  ;;  %v1489_v59 = vshll.u32 %v4344_v2, 16  ;;  %v1250_v29 = vor.u32 %v1249_v9, %v1246_v13  ;;  %v1864_v25 = vld [vmem:[#allocation2 + $0x20] sm:$0x1] }
 0x181   : > { %3623 = vmatpush3.bf16.msra.mxu0 %v3809_v16  ;;  %v4388_v28 = vrot.slane %v1507_v4, 11  ;;  %v1520_v40 = vshrl.u32 %v4375_v51, 16  ;;  %v4394_v42 = vor.u32 %v1476_v49, %v1475_v47  ;;  %v4396_v60 = vrot.slane %v1253_v12, 5 }
 0x182   : > { %3603 = vmatpush3.bf16.msra.mxu1 %v3810_v17  ;;  %3624 = vmatprep.subr.bf16.mxu0 %v3811_v11  ;;  %v4398_v16 = vrot.slane %v1267_v41, 5  ;;  %v1501_v21 = vrot.slane %v1499_v50, 7  ;;  %v3188_v53 = vcombine.low %v1200_v48, %v1214_v52  ;;  %v1491_v3 = vor.u32 %v1489_v59, %v1488_v54  ;;  %v3817_v52 = vld [vmem:[%s4753_s2 + $0x178] sm:$0xff]  }
 0x183   : > { %3604 = vmatprep.subr.bf16.mxu1 %v3812_v39  ;;  %v1264_v17 = vor.u32 %v1263_v45, %v1260_v55  ;;  %v1514_v36 = vrot.slane %v1512_v26, 7  ;;  %v1228_v57 = vsel %vm4227_vm2, %v1223_v20, %v4348_v6  ;;  %v1242_v31 = vsel %vm4227_vm2, %v1237_v56, %v4369_v1  ;;  %v3815_v6 = vld [vmem:[%s4753_s2 + $0xc0] sm:$0xff]  }
 0x184   : > { %v1502_v4 = vshll.u32 %v4361_v38, 16  ;;  %v1878_v5 = vshrl.u32 %v1861_v44, 16  ;;  %v1251_v7 = vrot.slane %v1250_v29, 4  ;;  %v1515_v10 = vshll.u32 %v4371_v43, 16 }
 0x185   : > { %3625 = vmatpush3.bf16.msra.mxu0 %v3811_v11  ;;  %v1881_v8 = vshll.u32 %v1861_v44, 16  ;;  %v1892_v33 = vshrl.u32 %v1863_v63, 16  ;;  %v3816_v11 = vld [vmem:[%s4753_s2 + $0x130] sm:$0xff]   ;;  %v1525_v62 = vshrl.u32 %v4400_v30, 16  ;;  %v1895_v1 = vshll.u32 %v1863_v63, 16 }
 0x186   : > { %3605 = vmatpush3.bf16.msra.mxu1 %v3812_v39  ;;  %3626 = vmatprep.subr.bf16.mxu0 %v3813_v15  ;;  %v1504_v27 = vor.u32 %v1502_v4, %v1501_v21  ;;  %v1538_v39 = vshrl.u32 %v4402_v0, 16  ;;  %v3189_v12 = vcombine.low %v1228_v57, %v1242_v31  ;;  %v1265_v13 = vrot.slane %v1264_v17, 4 }
 0x187   : > { %3638 = vmatprep.subr.bf16.mxu1 %v3814_v24  ;;  %v1517_v9 = vor.u32 %v1515_v10, %v1514_v36  ;;  %v1880_v18 = vrot.slane %v1878_v5, 4  ;;  %v1533_v41 = vshrl.u32 %v1439_v22, 16  ;;  %v1883_v47 = vrot.slane %v1881_v8, 5  ;;  %v3822_v22 = vld [vmem:[%s4753_s2 + $0x168] sm:$0xff]   ;;  %v3824_v10 = vld [vmem:[%s4753_s2 + $0x160] sm:$0xff]  }
 0x188   : > { %v1894_v49 = vrot.slane %v1892_v33, 4  ;;  %v1897_v23 = vrot.slane %v1895_v1, 5  ;;  %v1479_v50 = vsel %vm4213_vm1, %v4339_v19, %v4394_v42  ;;  %v1492_v48 = vsel %vm4213_vm1, %v4352_v37, %v1491_v3  ;;  %v3818_v37 = vld [vmem:[%s4753_s2 + $0x128] sm:$0xff]   ;;  %v3821_v3 = vld [vmem:[%s4753_s2 + $0x120] sm:$0xff]   ;;  %v1867_v33 = vld [vmem:[#allocation2 + $0x34] sm:$0xf] }
 0x189   : > { %3607 = vmatmul.mubr.bf16.vlgmr.msra.gmra.mxu1 %v3188_v53  ;;  %3627 = vmatpush3.bf16.msra.mxu0 %v3813_v15  ;;  %v1887_v54 = vshll.u32 %v1862_v14, 16  ;;  %v1901_v55 = vshll.u32 %v1864_v25, 16  ;;  %v1256_v20 = vsel %vm4227_vm2, %v1251_v7, %v4396_v60  ;;  %v1505_v19 = vsel %vm4213_vm1, %v4356_v32, %v1504_v27  ;;  %v3823_v14 = vld [vmem:[%s4753_s2 + $0x118] sm:$0xff]   ;;  %v3825_v25 = vld [vmem:[%s4753_s2 + $0x110] sm:$0xff]   ;;  %v1865_v8 = vld [vmem:[#allocation2 + $0x28] sm:$0xf] }
 0x18a   : > { %3610 = vmatprep.mubr.bf16.mxu1 %v3189_v12  ;;  %3639 = vmatpush3.bf16.msra.mxu1 %v3814_v24  ;;  %v1527_v56 = vrot.slane %v1525_v62, 7  ;;  %v1540_v45 = vrot.slane %v1538_v39, 7  ;;  %v1270_v26 = vsel %vm4227_vm2, %v1265_v13, %v4398_v16  ;;  %v1518_v15 = vsel %vm4213_vm1, %v4388_v28, %v1517_v9  ;;  %v3820_v28 = vld [vmem:[%s4753_s2 + $0x170] sm:$0xff]   ;;  %v3826_v27 = vld [vmem:[%s4753_s2 + $0x158] sm:$0xff]   ;;  %v3827_v62 = vld [vmem:[%s4753_s2 + $0x108] sm:$0xff]  }
 0x18b   : > { %3628 = vmatprep.subr.bf16.mxu0 %v3815_v6  ;;  %3640 = vmatprep.subr.bf16.mxu1 %v3816_v11  ;;  %v1884_v59 = vor.u32 %v1883_v47, %v1880_v18  ;;  %v1898_v29 = vor.u32 %v1897_v23, %v1894_v49  ;;  %v1528_v44 = vshll.u32 %v4400_v30, 16  ;;  %v1541_v32 = vshll.u32 %v4402_v0, 16  ;;  %v1866_v9 = vld [vmem:[#allocation2 + $0x2c] sm:$0x1]  ;;  %v1868_v18 = vld [vmem:[#allocation2 + $0x38] sm:$0x1] }
 0x18c   : > { %v3224_v24 = vcombine.low %v1479_v50, %v1492_v48  ;;  %v3205_v42 = vrot.slane %v1520_v40, 11  ;;  %v3206_v60 = vrot.slane %v1533_v41, 11  ;;  %v3190_v21 = vcombine.low %v1256_v20, %v1270_v26  ;;  %v4483_v41 = vld [vmem:[#allocation2 + $0x44] sm:$0x1]  ;;  %v4485_v47 = vld [vmem:[#allocation2 + $0x50] sm:$0x1] }
 0x18d   : > { %3629 = vmatpush3.bf16.msra.mxu0 %v3815_v6  ;;  %v3225_v16 = vcombine.low %v1505_v19, %v1518_v15  ;;  %v1530_v63 = vor.u32 %v1528_v44, %v1527_v56  ;;  %v1543_v53 = vor.u32 %v1541_v32, %v1540_v45  ;;  %v1885_v17 = vrot.slane %v1884_v59, 4  ;;  %v1869_v6 = vld [vmem:[#allocation2 + $0x40] sm:$0xf]  ;;  %v4495_v20 = vld [vmem:[#allocation2 + $0x1c] sm:$0xf] }
 0x18e   : > { %3641 = vmatpush3.bf16.msra.mxu1 %v3816_v11  ;;  %3662 = vmatprep.subr.bf16.mxu0 %v3817_v52  ;;  %v1889_v36 = vrot.slane %v1887_v54, 5  ;;  %v1899_v57 = vrot.slane %v1898_v29, 4  ;;  %v1903_v51 = vrot.slane %v1901_v55, 5  ;;  %v3251_v40 = vcombine.low %v4252_v46, %v4272_v58  ;;  %v1871_v11 = vld [vmem:[#allocation2 + $0x4c] sm:$0xf]  ;;  %v3829_v54 = vld [vmem:[%s4753_s2 + $0x100] sm:$0xff]  }
 0x18f   : > { %3642 = vmatprep.subr.bf16.mxu1 %v3818_v37  ;;  %v1531_v31 = vsel %vm4213_vm1, %v3205_v42, %v1530_v63  ;;  %v1544_v4 = vsel %vm4213_vm1, %v3206_v60, %v1543_v53  ;;  %v1906_v39 = vshrl.u32 %v1865_v8, 16  ;;  %v1909_v1 = vshll.u32 %v1865_v8, 16  ;;  %v4493_v55 = vld [vmem:[#allocation2 + $0x18] sm:$0x8]  ;;  %v4497_v26 = vld [vmem:[#allocation2 + $0x28] sm:$0xf] }
 0x190   : > { %3631 = vmatmul.mubr.bf16.vlgmr.msra.gmra.mxu0 %v3224_v24  ;;  %v1890_v46 = vsel %vm4227_vm2, %v1885_v17, %v1889_v36  ;;  %v1904_v58 = vsel %vm4227_vm2, %v1899_v57, %v1903_v51  ;;  %v3226_v5 = vcombine.low %v1531_v31, %v1544_v4  ;;  %v1920_v12 = vshrl.u32 %v1867_v33, 16  ;;  %v2146_v29 = vld [vmem:[#allocation2 + $0x24] sm:$0x8]  ;;  %v1873_v44 = vld [vmem:[#allocation2 + $0x58] sm:$0xf] }
 0x191   : > { %3611 = vmatmul.mubr.bf16.gmra.mxu1 %v3190_v21  ;;  %3634 = vmatprep.mubr.bf16.mxu0 %v3225_v16  ;;  %v3279_v7 = vcombine.low %v1890_v46, %v1904_v58  ;;  %v1923_v13 = vshll.u32 %v1867_v33, 16  ;;  %v1934_v49 = vshrl.u32 %v1869_v6, 16  ;;  %v1937_v23 = vshll.u32 %v1869_v6, 16  ;;  %v1875_v21 = vld [vmem:[#allocation2 + $0x64] sm:$0xf]  ;;  %v3832_v17 = vld [vmem:[%s4753_s2 + $0x1b8] sm:$0xff]  }
 0x192   : > { %3663 = vmatpush3.bf16.msra.mxu0 %v3817_v52  ;;  %3643 = vmatpush3.bf16.msra.mxu1 %v3818_v37  ;;  %v1948_v50 = vshrl.u32 %v1871_v11, 16  ;;  %v1951_v48 = vshll.u32 %v1871_v11, 16  ;;  %v3828_v52 = vld [vmem:[%s4753_s2 + $0x150] sm:$0xff]   ;;  %v1908_v19 = vrot.slane %v1906_v39, 4  ;;  %v1911_v37 = vrot.slane %v1909_v1, 5 }
 0x193   : > { %3654 = vmatprep.mubr.bf16.mxu1 %v3251_v40  ;;  %3664 = vmatprep.subr.bf16.mxu0 %v3820_v28  ;;  %v1922_v56 = vrot.slane %v1920_v12, 4  ;;  %v1925_v45 = vrot.slane %v1923_v13, 5  ;;  %v1915_v15 = vshll.u32 %v1866_v9, 16  ;;  %v1929_v59 = vshll.u32 %v1868_v18, 16  ;;  %v1874_v6 = vld [vmem:[#allocation2 + $0x5c] sm:$0x1] }
 0x194   : > { %3644 = vmatprep.subr.bf16.mxu1 %v3821_v3  ;;  %v1936_v32 = vrot.slane %v1934_v49, 4  ;;  %v1939_v24 = vrot.slane %v1937_v23, 5  ;;  %v1950_v42 = vrot.slane %v1948_v50, 4  ;;  %v1953_v60 = vrot.slane %v1951_v48, 5  ;;  %v1876_v11 = vld [vmem:[#allocation2 + $0x68] sm:$0x1] }
 0x195   : > { %v1943_v16 = vshll.u32 %v4483_v41, 16  ;;  %v2166_v63 = vshrl.u32 %v4495_v20, 16  ;;  %v2179_v53 = vshrl.u32 %v4497_v26, 16  ;;  %v1912_v36 = vor.u32 %v1911_v37, %v1908_v19 }
 0x196   : > { %3665 = vmatpush3.bf16.msra.mxu0 %v3820_v28  ;;  %3645 = vmatpush3.bf16.msra.mxu1 %v3821_v3  ;;  %v1957_v28 = vshll.u32 %v4485_v47, 16  ;;  %v3830_v3 = vld [vmem:[%s4753_s2 + $0x148] sm:$0xff]   ;;  %v1926_v57 = vor.u32 %v1925_v45, %v1922_v56  ;;  %v2161_v51 = vshrl.u32 %v4493_v55, 16  ;;  %v2174_v40 = vshrl.u32 %v2146_v29, 16 }
 0x197   : > { %3666 = vmatprep.subr.bf16.mxu0 %v3822_v22  ;;  %3646 = vmatprep.subr.bf16.mxu1 %v3823_v14  ;;  %v1962_v31 = vshrl.u32 %v1873_v44, 16  ;;  %v1965_v4 = vshll.u32 %v1873_v44, 16  ;;  %v1917_v46 = vrot.slane %v1915_v15, 5  ;;  %v1931_v58 = vrot.slane %v1929_v59, 5  ;;  %v3838_v56 = vld [vmem:[%s4753_s2 + $0x1a8] sm:$0xff]  }
 0x198   : > { %3635 = vmatmul.mubr.bf16.gmra.mxu0 %v3226_v5  ;;  %v1940_v5 = vor.u32 %v1939_v24, %v1936_v32  ;;  %v2168_v8 = vrot.slane %v2166_v63, 7  ;;  %v2181_v33 = vrot.slane %v2179_v53, 7  ;;  %v1927_v39 = vrot.slane %v1926_v57, 4  ;;  %v3842_v57 = vld [vmem:[%s4753_s2 + $0x198] sm:$0xff]  }
 0x199   : > { %3678 = vmatprep.mubr.bf16.mxu0 %v3279_v7  ;;  %v1954_v7 = vor.u32 %v1953_v60, %v1950_v42  ;;  %v2169_v1 = vshll.u32 %v4495_v20, 16  ;;  %v2182_v12 = vshll.u32 %v4497_v26, 16  ;;  %v1945_v18 = vrot.slane %v1943_v16, 5  ;;  %v3839_v16 = vld [vmem:[%s4753_s2 + $0x1f0] sm:$0xff]  }
 0x19a   : > { %3667 = vmatpush3.bf16.msra.mxu0 %v3822_v22  ;;  %3647 = vmatpush3.bf16.msra.mxu1 %v3823_v14  ;;  %v1976_v22 = vshrl.u32 %v1875_v21, 16  ;;  %v1979_v14 = vshll.u32 %v1875_v21, 16  ;;  %v1941_v9 = vrot.slane %v1940_v5, 4  ;;  %v1959_v47 = vrot.slane %v1957_v28, 5  ;;  %v3840_v28 = vld [vmem:[%s4753_s2 + $0x1a0] sm:$0xff]  }
 0x19b   : > { %3668 = vmatprep.subr.bf16.mxu0 %v3824_v10  ;;  %3648 = vmatprep.subr.bf16.mxu1 %v3825_v25  ;;  %v1955_v41 = vrot.slane %v1954_v7, 4  ;;  %v3291_v49 = vrot.slane %v2161_v51, 11  ;;  %v2171_v23 = vor.u32 %v2169_v1, %v2168_v8  ;;  %v3292_v50 = vrot.slane %v2174_v40, 11  ;;  %v2148_v51 = vld [vmem:[#allocation2 + $0x30] sm:$0x8]  ;;  %v3847_v1 = vld [vmem:[%s4753_s2 + $0x188] sm:$0xff]  }
 0x19c   : > { %v1981_v13 = vrot.slane %v1979_v14, 5  ;;  %v2184_v48 = vor.u32 %v2182_v12, %v2181_v33  ;;  %v1985_v55 = vshll.u32 %v1876_v11, 16  ;;  %v1932_v37 = vsel %vm4227_vm2, %v1927_v39, %v1931_v58  ;;  %v4558_v40 = vld [vmem:[#allocation2 + $0x34] sm:$0xf]  ;;  %v2150_v58 = vld [vmem:[#allocation2 + $0x3c] sm:$0x8] }
 0x19d   : > { %v1946_v59 = vsel %vm4227_vm2, %v1941_v9, %v1945_v18  ;;  %v1960_v29 = vsel %vm4227_vm2, %v1955_v41, %v1959_v47  ;;  %v2172_v44 = vsel %vm4213_vm1, %v3291_v49, %v2171_v23  ;;  %v3254_v42 = vcombine.low %v4400_v30, %v4402_v0  ;;  %v3841_v30 = vld [vmem:[%s4753_s2 + $0x1e8] sm:$0xff]   ;;  %v3845_v7 = vld [vmem:[%s4753_s2 + $0x190] sm:$0xff]   ;;  %v4589_v47 = vld [vmem:[#allocation2 + $0x64] sm:$0xf] }
 0x19e   : > { %3669 = vmatpush3.bf16.msra.mxu0 %v3824_v10  ;;  %3649 = vmatpush3.bf16.msra.mxu1 %v3825_v25  ;;  %v3252_v10 = vcombine.low %v4335_v61, %v4344_v2  ;;  %v3253_v25 = vcombine.low %v4361_v38, %v4371_v43  ;;  %v3835_v61 = vld [vmem:[%s4753_s2 + $0x1b0] sm:$0xff]   ;;  %v1964_v2 = vrot.slane %v1962_v31, 4  ;;  %v1967_v38 = vrot.slane %v1965_v4, 5  ;;  %v4560_v31 = vld [vmem:[#allocation2 + $0x40] sm:$0xf] }
 0x19f   : > { %3670 = vmatprep.subr.bf16.mxu0 %v3826_v27  ;;  %3650 = vmatprep.subr.bf16.mxu1 %v3827_v62  ;;  %v1978_v43 = vrot.slane %v1976_v22, 4  ;;  %v2185_v32 = vsel %vm4213_vm1, %v3292_v50, %v2184_v48  ;;  %v3281_v21 = vcombine.low %v1946_v59, %v1960_v29  ;;  %v4562_v4 = vld [vmem:[#allocation2 + $0x4c] sm:$0xf]  ;;  %v4564_v22 = vld [vmem:[#allocation2 + $0x58] sm:$0xf]  ;;  %v3343_v5 = vcombine.low %v4495_v20, %v4497_v26 }
 0x1a0   : > { %v1968_v45 = vor.u32 %v1967_v38, %v1964_v2  ;;  %v2152_v8 = vld [vmem:[#allocation2 + $0x48] sm:$0x8]  ;;  %v2205_v33 = vshrl.u32 %v4560_v31, 16  ;;  %v2218_v11 = vshrl.u32 %v4562_v4, 16  ;;  %v3846_v20 = vld [vmem:[%s4753_s2 + $0x1d8] sm:$0xff]   ;;  %v2200_v26 = vshrl.u32 %v2150_v58, 16 }
 0x1a1   : > { %v1982_v15 = vor.u32 %v1981_v13, %v1978_v43  ;;  %v2582_v39 = vld [vmem:[#allocation2 + $0x28] sm:$0xf]  ;;  %v2213_v2 = vshrl.u32 %v2152_v8, 16  ;;  %v2195_v43 = vshll.u32 %v4558_v40, 16  ;;  %v4587_v41 = vld [vmem:[#allocation2 + $0x70] sm:$0xf] }
 0x1a2   : > { %3671 = vmatpush3.bf16.msra.mxu0 %v3826_v27  ;;  %3651 = vmatpush3.bf16.msra.mxu1 %v3827_v62  ;;  %v3834_v27 = vld [vmem:[%s4753_s2 + $0x140] sm:$0xff]   ;;  %v1913_v62 = vrot.slane %v1912_v36, 4  ;;  %v1969_v63 = vrot.slane %v1968_v45, 4  ;;  %v2207_v13 = vrot.slane %v2205_v33, 7  ;;  %v2220_v9 = vrot.slane %v2218_v11, 7 }
 0x1a3   : > { %3672 = vmatprep.subr.bf16.mxu0 %v3828_v52  ;;  %3652 = vmatprep.subr.bf16.mxu1 %v3829_v54  ;;  %v1983_v53 = vrot.slane %v1982_v15, 4  ;;  %v2611_v50 = vshrl.u32 %v2582_v39, 16  ;;  %v2614_v48 = vshll.u32 %v2582_v39, 16  ;;  %v3295_v15 = vrot.slane %v2213_v2, 11  ;;  %v2156_v29 = vld [vmem:[#allocation2 + $0x60] sm:$0x8] }
 0x1a4   : > { %v1918_v19 = vsel %vm4227_vm2, %v1913_v62, %v1917_v46  ;;  %v3844_v46 = vld [vmem:[%s4753_s2 + $0x1e0] sm:$0xff]   ;;  %v2580_v62 = vld [vmem:[#allocation2 + $0x1c] sm:$0xf]  ;;  %v2247_v11 = vshll.u32 %v4589_v47, 16 }
 0x1a5   : > { %v3280_v24 = vcombine.low %v1918_v19, %v1932_v37  ;;  %v2597_v49 = vshrl.u32 %v2580_v62, 16  ;;  %v2600_v23 = vshll.u32 %v2580_v62, 16  ;;  %v2221_v19 = vshll.u32 %v4562_v4, 16 }
 0x1a6   : > { %3673 = vmatpush3.bf16.msra.mxu0 %v3828_v52  ;;  %3653 = vmatpush3.bf16.msra.mxu1 %v3829_v54  ;;  %v3836_v52 = vld [vmem:[%s4753_s2 + $0x1f8] sm:$0xff]   ;;  %v1971_v54 = vshll.u32 %v1874_v6, 16  ;;  %v2154_v6 = vld [vmem:[#allocation2 + $0x54] sm:$0x8]  ;;  %v2234_v37 = vshll.u32 %v4564_v22, 16 }
 0x1a7   : > { %3674 = vmatprep.subr.bf16.mxu0 %v3830_v3  ;;  %3686 = vmatprep.subr.bf16.mxu1 %v3832_v17  ;;  %v2226_v38 = vshrl.u32 %v2154_v6, 16 }
 0x1a8   : > { %v1973_v60 = vrot.slane %v1971_v54, 5  ;;  %v3294_v54 = vrot.slane %v2200_v26, 11  ;;  %v3853_v26 = vld [vmem:[%s4753_s2 + $0x230] sm:$0xff]  }
 0x1a9   : > { %3655 = vmatmul.mubr.bf16.vlgmr.msra.gmra.mxu1 %v3252_v10  ;;  %v2187_v10 = vshrl.u32 %v2148_v51, 16  ;;  %v3296_v59 = vrot.slane %v2226_v38, 11 }
 0x1aa   : > { %3675 = vmatpush3.bf16.msra.mxu0 %v3830_v3  ;;  %3658 = vmatprep.mubr.bf16.mxu1 %v3253_v25  ;;  %v1987_v3 = vrot.slane %v1985_v55, 5  ;;  %v1974_v0 = vsel %vm4227_vm2, %v1969_v63, %v1973_v60  ;;  %v2192_v25 = vshrl.u32 %v4558_v40, 16  ;;  %v2208_v55 = vshll.u32 %v4560_v31, 16  ;;  %v2158_v60 = vld [vmem:[#allocation2 + $0x6c] sm:$0x8] }
 0x1ab   : > { %3687 = vmatpush3.bf16.msra.mxu1 %v3832_v17  ;;  %3676 = vmatprep.subr.bf16.mxu0 %v3834_v27  ;;  %v3315_v17 = vcombine.low %v2172_v44, %v2185_v32  ;;  %v4584_v12 = vrot.slane %v2187_v10, 11  ;;  %v2257_v44 = vshrl.u32 %v4587_v41, 16  ;;  %v2599_v63 = vrot.slane %v2597_v49, 4 }
 0x1ac   : > { %3688 = vmatprep.subr.bf16.mxu1 %v3835_v61  ;;  %v1988_v36 = vsel %vm4227_vm2, %v1983_v53, %v1987_v3  ;;  %v2210_v32 = vor.u32 %v2208_v55, %v2207_v13  ;;  %v2602_v53 = vrot.slane %v2600_v23, 5  ;;  %v2613_v3 = vrot.slane %v2611_v50, 4 }
 0x1ad   : > { %v3282_v14 = vcombine.low %v1974_v0, %v1988_v36  ;;  %v2239_v0 = vshrl.u32 %v2156_v29, 16  ;;  %v3851_v36 = vld [vmem:[%s4753_s2 + $0x238] sm:$0xff]   ;;  %v2259_v51 = vrot.slane %v2257_v44, 7 }
 0x1ae   : > { %3677 = vmatpush3.bf16.msra.mxu0 %v3834_v27  ;;  %v2231_v27 = vshrl.u32 %v4564_v22, 16  ;;  %v2603_v33 = vor.u32 %v2602_v53, %v2599_v63 }
 0x1af   : > { %3689 = vmatpush3.bf16.msra.mxu1 %v3835_v61  ;;  %3710 = vmatprep.subr.bf16.mxu0 %v3836_v52  ;;  %v2194_v61 = vrot.slane %v2192_v25, 7  ;;  %v3297_v62 = vrot.slane %v2239_v0, 11 }
 0x1b0   : > { %3690 = vmatprep.subr.bf16.mxu1 %v3838_v56  ;;  %v2233_v18 = vrot.slane %v2231_v27, 7  ;;  %v2604_v2 = vrot.slane %v2603_v33, 4 }
 0x1b1   : > { %3679 = vmatmul.mubr.bf16.vlgmr.msra.gmra.mxu0 %v3280_v24  ;;  %3659 = vmatmul.mubr.bf16.gmra.mxu1 %v3254_v42  ;;  %v2197_v45 = vor.u32 %v2195_v43, %v2194_v61  ;;  %v2223_v24 = vor.u32 %v2221_v19, %v2220_v9  ;;  %v3856_v9 = vld [vmem:[%s4753_s2 + $0x228] sm:$0xff]   ;;  %v2584_v19 = vld [vmem:[#allocation2 + $0x34] sm:$0xf] }
 0x1b2   : > { %3682 = vmatprep.mubr.bf16.mxu0 %v3281_v21  ;;  %3711 = vmatpush3.bf16.msra.mxu0 %v3836_v52  ;;  %v3848_v52 = vld [vmem:[%s4753_s2 + $0x1d0] sm:$0xff]   ;;  %v2236_v42 = vor.u32 %v2234_v37, %v2233_v18  ;;  %v2244_v21 = vshrl.u32 %v4589_v47, 16  ;;  %v2586_v37 = vld [vmem:[#allocation2 + $0x40] sm:$0xf] }
 0x1b3   : > { %3691 = vmatpush3.bf16.msra.mxu1 %v3838_v56  ;;  %3702 = vmatprep.mubr.bf16.mxu1 %v3315_v17  ;;  %v3849_v56 = vld [vmem:[%s4753_s2 + $0x180] sm:$0xff]   ;;  %v2616_v17 = vrot.slane %v2614_v48, 5  ;;  %v2198_v58 = vsel %vm4213_vm1, %v4584_v12, %v2197_v45  ;;  %v2224_v25 = vsel %vm4213_vm1, %v3295_v15, %v2223_v24  ;;  %v3344_v48 = vcombine.low %v4558_v40, %v4560_v31  ;;  %v2590_v45 = vld [vmem:[#allocation2 + $0x58] sm:$0xf] }
 0x1b4   : > { %3712 = vmatprep.subr.bf16.mxu0 %v3839_v16  ;;  %3692 = vmatprep.subr.bf16.mxu1 %v3840_v28  ;;  %v2237_v8 = vsel %vm4213_vm1, %v3296_v59, %v2236_v42  ;;  %v3859_v40 = vld [vmem:[%s4753_s2 + $0x218] sm:$0xff]   ;;  %v2625_v31 = vshrl.u32 %v2584_v19, 16  ;;  %v2642_v15 = vshll.u32 %v2586_v37, 16  ;;  %v2667_v44 = vshrl.u32 %v2590_v45, 16  ;;  %v3860_v42 = vld [vmem:[%s4753_s2 + $0x210] sm:$0xff]  }
 0x1b5   : > { %v2617_v6 = vor.u32 %v2616_v17, %v2613_v3  ;;  %v3317_v39 = vcombine.low %v2224_v25, %v2237_v8  ;;  %v3346_v24 = vcombine.low %v4589_v47, %v4587_v41  ;;  %v2594_v3 = vld [vmem:[#allocation2 + $0x70] sm:$0xf] }
 0x1b6   : > { %3713 = vmatpush3.bf16.msra.mxu0 %v3839_v16  ;;  %v2581_v16 = vld [vmem:[#allocation2 + $0x20] sm:$0x1]  ;;  %v2644_v53 = vrot.slane %v2642_v15, 5  ;;  %v2669_v0 = vrot.slane %v2667_v44, 4  ;;  %v2589_v47 = vld [vmem:[#allocation2 + $0x50] sm:$0x1] }
 0x1b7   : > { %3693 = vmatpush3.bf16.msra.mxu1 %v3840_v28  ;;  %3714 = vmatprep.subr.bf16.mxu0 %v3841_v30  ;;  %v2583_v28 = vld [vmem:[#allocation2 + $0x2c] sm:$0x1]  ;;  %v2618_v43 = vrot.slane %v2617_v6, 4  ;;  %v2662_v6 = vshll.u32 %v2589_v47, 16 }
 0x1b8   : > { %3694 = vmatprep.subr.bf16.mxu1 %v3842_v57  ;;  %v2620_v10 = vshll.u32 %v2583_v28, 16 }
 0x1b9   : > { %3683 = vmatmul.mubr.bf16.gmra.mxu0 %v3282_v14  ;;  %v2260_v14 = vshll.u32 %v4587_v41, 16 }
 0x1ba   : > { %3715 = vmatpush3.bf16.msra.mxu0 %v3841_v30  ;;  %3726 = vmatprep.mubr.bf16.mxu0 %v3343_v5  ;;  %v3850_v30 = vld [vmem:[%s4753_s2 + $0x1c8] sm:$0xff]   ;;  %v2211_v5 = vsel %vm4213_vm1, %v3294_v54, %v2210_v32  ;;  %v2622_v13 = vrot.slane %v2620_v10, 5  ;;  %v3345_v54 = vcombine.low %v4562_v4, %v4564_v22  ;;  %v2628_v4 = vshll.u32 %v2584_v19, 16 }
 0x1bb   : > { %3695 = vmatpush3.bf16.msra.mxu1 %v3842_v57  ;;  %3716 = vmatprep.subr.bf16.mxu0 %v3844_v46  ;;  %v2252_v57 = vshrl.u32 %v2158_v60, 16  ;;  %v3316_v27 = vcombine.low %v2198_v58, %v2211_v5  ;;  %v2262_v61 = vor.u32 %v2260_v14, %v2259_v51  ;;  %v2639_v22 = vshrl.u32 %v2586_v37, 16  ;;  %v2585_v60 = vld [vmem:[#allocation2 + $0x38] sm:$0x1]  ;;  %v2591_v51 = vld [vmem:[#allocation2 + $0x5c] sm:$0x1] }
 0x1bc   : > { %3696 = vmatprep.subr.bf16.mxu1 %v3845_v7  ;;  %v2623_v50 = vsel %vm4227_vm2, %v2618_v43, %v2622_v13  ;;  %v2670_v32 = vshll.u32 %v2590_v45, 16  ;;  %v2630_v28 = vrot.slane %v2628_v4, 5  ;;  %v2634_v41 = vshll.u32 %v2585_v60, 16  ;;  %v3861_v14 = vld [vmem:[%s4753_s2 + $0x208] sm:$0xff]  }
 0x1bd   : > { %v3298_v12 = vrot.slane %v2252_v57, 11  ;;  %v2641_v63 = vrot.slane %v2639_v22, 4  ;;  %v2592_v57 = vld [vmem:[#allocation2 + $0x64] sm:$0xf]  ;;  %v2695_v58 = vshrl.u32 %v2594_v3, 16  ;;  %v2698_v5 = vshll.u32 %v2594_v3, 16 }
 0x1be   : > { %3717 = vmatpush3.bf16.msra.mxu0 %v3844_v46  ;;  %v2606_v46 = vshll.u32 %v2581_v16, 16  ;;  %v2627_v16 = vrot.slane %v2625_v31, 4  ;;  %v2681_v25 = vshrl.u32 %v2592_v57, 16  ;;  %v2684_v8 = vshll.u32 %v2592_v57, 16 }
 0x1bf   : > { %3697 = vmatpush3.bf16.msra.mxu1 %v3845_v7  ;;  %3718 = vmatprep.subr.bf16.mxu0 %v3846_v20  ;;  %v2246_v7 = vrot.slane %v2244_v21, 7  ;;  %v2263_v49 = vsel %vm4213_vm1, %v3298_v12, %v2262_v61  ;;  %v2587_v21 = vld [vmem:[#allocation2 + $0x44] sm:$0x1]  ;;  %v2645_v10 = vor.u32 %v2644_v53, %v2641_v63  ;;  %v2700_v12 = vrot.slane %v2698_v5, 5 }
 0x1c0   : > { %3698 = vmatprep.subr.bf16.mxu1 %v3847_v1  ;;  %v2608_v38 = vrot.slane %v2606_v46, 5  ;;  %v2648_v46 = vshll.u32 %v2587_v21, 16  ;;  %v2683_v43 = vrot.slane %v2681_v25, 4  ;;  %v2686_v13 = vrot.slane %v2684_v8, 5 }
 0x1c2   : > { %3719 = vmatpush3.bf16.msra.mxu0 %v3846_v20  ;;  %v3852_v20 = vld [vmem:[%s4753_s2 + $0x1c0] sm:$0xff]   ;;  %v2609_v23 = vsel %vm4227_vm2, %v2604_v2, %v2608_v38  ;;  %v2646_v2 = vrot.slane %v2645_v10, 4  ;;  %v2595_v38 = vld [vmem:[#allocation2 + $0x74] sm:$0x1] }
 0x1c3   : > { %3699 = vmatpush3.bf16.msra.mxu1 %v3847_v1  ;;  %3720 = vmatprep.subr.bf16.mxu0 %v3848_v52  ;;  %v2249_v1 = vor.u32 %v2247_v11, %v2246_v7  ;;  %v3371_v55 = vcombine.low %v2609_v23, %v2623_v50  ;;  %v2631_v7 = vor.u32 %v2630_v28, %v2627_v16 }
 0x1c4   : > { %3700 = vmatprep.subr.bf16.mxu1 %v3849_v56 }
 0x1c5   : > { %v2250_v18 = vsel %vm4213_vm1, %v3297_v62, %v2249_v1  ;;  %v2650_v62 = vrot.slane %v2648_v46, 5  ;;  %v2697_v1 = vrot.slane %v2695_v58, 4  ;;  %v2632_v61 = vrot.slane %v2631_v7, 4 }
 0x1c6   : > { %3721 = vmatpush3.bf16.msra.mxu0 %v3848_v52  ;;  %v3318_v52 = vcombine.low %v2250_v18, %v2263_v49  ;;  %v2664_v18 = vrot.slane %v2662_v6, 5 }
 0x1c7   : > { %3701 = vmatpush3.bf16.msra.mxu1 %v3849_v56  ;;  %3722 = vmatprep.subr.bf16.mxu0 %v3850_v30  ;;  %v2588_v56 = vld [vmem:[#allocation2 + $0x4c] sm:$0xf] }
 0x1c8   : > { %3734 = vmatprep.subr.bf16.mxu1 %v3851_v36  ;;  %v2653_v59 = vshrl.u32 %v2588_v56, 16  ;;  %v2656_v29 = vshll.u32 %v2588_v56, 16 }
 0x1ca   : > { %3703 = vmatmul.mubr.bf16.vlgmr.msra.gmra.mxu1 %v3316_v27  ;;  %3723 = vmatpush3.bf16.msra.mxu0 %v3850_v30  ;;  %v2655_v17 = vrot.slane %v2653_v59, 4  ;;  %v2658_v30 = vrot.slane %v2656_v29, 5  ;;  %v2676_v27 = vshll.u32 %v2591_v51, 16 }
 0x1cb   : > { %3706 = vmatprep.mubr.bf16.mxu1 %v3317_v39  ;;  %3735 = vmatpush3.bf16.msra.mxu1 %v3851_v36  ;;  %v2672_v36 = vrot.slane %v2670_v32, 5  ;;  %v2593_v39 = vld [vmem:[#allocation2 + $0x68] sm:$0x1] }
 0x1cc   : > { %3724 = vmatprep.subr.bf16.mxu0 %v3852_v20  ;;  %3736 = vmatprep.subr.bf16.mxu1 %v3853_v26  ;;  %v2659_v33 = vor.u32 %v2658_v30, %v2655_v17  ;;  %v2678_v23 = vrot.slane %v2676_v27, 5  ;;  %v2690_v50 = vshll.u32 %v2593_v39, 16 }
 0x1cd   : > { %v2673_v11 = vor.u32 %v2672_v36, %v2669_v0 }
 0x1ce   : > { %3725 = vmatpush3.bf16.msra.mxu0 %v3852_v20  ;;  %v2636_v20 = vrot.slane %v2634_v41, 5  ;;  %v2692_v45 = vrot.slane %v2690_v50, 5 }
 0x1cf   : > { %3737 = vmatpush3.bf16.msra.mxu1 %v3853_v26  ;;  %v3862_v26 = vld [vmem:[%s4753_s2 + $0x200] sm:$0xff]   ;;  %v2674_v49 = vrot.slane %v2673_v11, 4 }
 0x1d0   : > { %3738 = vmatprep.subr.bf16.mxu1 %v3856_v9 }
 0x1d1   : > { %3727 = vmatmul.mubr.bf16.vlgmr.msra.gmra.mxu0 %v3344_v48  ;;  %v2704_v48 = vshll.u32 %v2595_v38, 16  ;;  %v2679_v37 = vsel %vm4227_vm2, %v2674_v49, %v2678_v23 }
 0x1d2   : > { %3707 = vmatmul.mubr.bf16.gmra.mxu1 %v3318_v52  ;;  %3730 = vmatprep.mubr.bf16.mxu0 %v3345_v54  ;;  %v2637_v52 = vsel %vm4227_vm2, %v2632_v61, %v2636_v20  ;;  %v2651_v54 = vsel %vm4227_vm2, %v2646_v2, %v2650_v62 }
 0x1d3   : > { %3739 = vmatpush3.bf16.msra.mxu1 %v3856_v9  ;;  %3750 = vmatprep.mubr.bf16.mxu1 %v3371_v55  ;;  %v2660_v9 = vrot.slane %v2659_v33, 4  ;;  %v2701_v55 = vor.u32 %v2700_v12, %v2697_v1  ;;  %v3372_v56 = vcombine.low %v2637_v52, %v2651_v54  ;;  %v2706_v22 = vrot.slane %v2704_v48, 5 }
 0x1d4   : > { %3740 = vmatprep.subr.bf16.mxu1 %v3857_v34 }
 0x1d5   : > { %v2665_v19 = vsel %vm4227_vm2, %v2660_v9, %v2664_v18  ;;  %v2702_v4 = vrot.slane %v2701_v55, 4 }
 0x1d7   : > { %3741 = vmatpush3.bf16.msra.mxu1 %v3857_v34  ;;  %v2687_v34 = vor.u32 %v2686_v13, %v2683_v43  ;;  %v2707_v59 = vsel %vm4227_vm2, %v2702_v4, %v2706_v22 }
 0x1d8   : > { %3742 = vmatprep.subr.bf16.mxu1 %v3859_v40 }
 0x1d9   : > { %3731 = vmatmul.mubr.bf16.gmra.mxu0 %v3346_v24  ;;  %v2688_v31 = vrot.slane %v2687_v34, 4 }
 0x1db   : > { %3743 = vmatpush3.bf16.msra.mxu1 %v3859_v40  ;;  %v3373_v40 = vcombine.low %v2665_v19, %v2679_v37  ;;  %v2693_v15 = vsel %vm4227_vm2, %v2688_v31, %v2692_v45 }
 0x1dc   : > { %3744 = vmatprep.subr.bf16.mxu1 %v3860_v42  ;;  %v3374_v29 = vcombine.low %v2693_v15, %v2707_v59 }
 0x1df   : > { %3745 = vmatpush3.bf16.msra.mxu1 %v3860_v42 }
 0x1e0   : > { %3746 = vmatprep.subr.bf16.mxu1 %v3861_v14 }
 0x1e3   : > { %3747 = vmatpush3.bf16.msra.mxu1 %v3861_v14 }
 0x1e4   : > { %3748 = vmatprep.subr.bf16.mxu1 %v3862_v26 }
 0x1e7   : > { %3749 = vmatpush3.bf16.msra.mxu1 %v3862_v26 }
 0x1ea   : > { %3751 = vmatmul.mubr.bf16.vlgmr.msra.gmra.mxu1 %v3372_v56 }
 0x1eb   : > { %3754 = vmatprep.mubr.bf16.mxu1 %v3373_v40 }
 0x1f2   : > { %3755 = vmatmul.mubr.bf16.gmra.mxu1 %v3374_v29 }
 0x229   : > { %v3560_v44 = vpop.f32.mrf.mxu1 }
 0x22b   : > { %v980_v32 = vpop.f32.mrf.mxu1 }
 0x22d   : > { %v3561_v24 = vpop.f32.mrf.mxu1 }
 0x22f   : > { %v983_v42 = vpop.f32.mrf.mxu1 }
 0x230   : > { %v3584_v60 = vpop.f32.mrf.mxu0 }
 0x231   : > { %v4669_v21 = vpop.f32.mrf.mxu1  ;;  %v1118_v15 = vadd.f32 %v3584_v60, %v3560_v44 }
 0x232   : > { %v1109_v16 = vpop.f32.mrf.mxu0 }
 0x233   : > { %v996_v28 = vpop.f32.mrf.mxu1  ;;  %v1110_v40 = vadd.f32 %v1109_v16, %v980_v32 }
 0x234   : > { %v3585_v63 = vpop.f32.mrf.mxu0 }
 0x235   : > { %v4671_v53 = vpop.f32.mrf.mxu1 }
 0x236   : > { %4768 = vst [vmem:[#allocation3_spill] sm:$0xff] %v4671_v53  ;;  %v1112_v3 = vpop.f32.mrf.mxu0 }
 0x237   : > { %v4673_v17 = vpop.f32.mrf.mxu1  ;;  %v1113_v31 = vadd.f32 %v1112_v3, %v983_v42 }
 0x238   : > { %v4675_v30 = vpop.f32.mrf.mxu0 }
 0x23a   : > { %v1125_v0 = vpop.f32.mrf.mxu0 }
 0x23c   : > { %v4677_v57 = vpop.f32.mrf.mxu0 }
 0x23d   : > { %4769 = vst [vmem:[#allocation4_spill] sm:$0xff] %v4677_v57 }
 0x23e   : > { %v1128_v47 = vpop.f32.mrf.mxu0 }
 0x23f   : > { %v1129_v32 = vadd.f32 %v1128_v47, %v4673_v17 }
 0x249   : > { %v3608_v35 = vpop.f32.mrf.mxu1 }
 0x24b   : > { %v1386_v36 = vpop.f32.mrf.mxu1 }
 0x24c   : > { %v1417_v59 = vadd.f32 %v1386_v36, %v1110_v40 }
 0x24d   : > { %v3609_v41 = vpop.f32.mrf.mxu1 }
 0x24f   : > { %v1389_v51 = vpop.f32.mrf.mxu1 }
 0x250   : > { %v3632_v14 = vpop.f32.mrf.mxu0  ;;  %v1418_v29 = vadd.f32 %v1389_v51, %v1113_v31 }
 0x251   : > { %v4679_v46 = vpop.f32.mrf.mxu1 }
 0x252   : > { %4770 = vst [vmem:[#allocation5_spill] sm:$0xff] %v4679_v46  ;;  %v1660_v58 = vpop.f32.mrf.mxu0 }
 0x253   : > { %v1402_v5 = vpop.f32.mrf.mxu1 }
 0x254   : > { %v3633_v7 = vpop.f32.mrf.mxu0 }
 0x255   : > { %v4681_v10 = vpop.f32.mrf.mxu1 }
 0x256   : > { %4771 = vst [vmem:[#allocation6_spill] sm:$0xff] %v4681_v10  ;;  %v1663_v25 = vpop.f32.mrf.mxu0 }
 0x257   : > { %v1405_v8 = vpop.f32.mrf.mxu1 }
 0x258   : > { %v4683_v33 = vpop.f32.mrf.mxu0 }
 0x259   : > { %4772 = vst [vmem:[#allocation7_spill] sm:$0xff] %v4683_v33  ;;  %v4781_v47 = vld [vmem:[#allocation5_spill] sm:$0xff] }
 0x25a   : > { %v1676_v11 = vpop.f32.mrf.mxu0 }
 0x25c   : > { %v4685_v20 = vpop.f32.mrf.mxu0 }
 0x25d   : > { %4773 = vst [vmem:[#allocation8_spill] sm:$0xff] %v4685_v20  ;;  %v1126_v20 = vadd.f32 %v1125_v0, %v996_v28 }
 0x25e   : > { %v1679_v62 = vpop.f32.mrf.mxu0 }
 0x25f   : > { %v1421_v42 = vadd.f32 %v1402_v5, %v1126_v20 }
 0x261   : > { %v1695_v28 = vadd.f32 %v1676_v11, %v1421_v42  ;;  %v4783_v11 = vld [vmem:[#allocation7_spill] sm:$0xff] }
 0x269   : > { %v3656_v6 = vpop.f32.mrf.mxu1 }
 0x26b   : > { %v1822_v27 = vpop.f32.mrf.mxu1 }
 0x26d   : > { %v3657_v26 = vpop.f32.mrf.mxu1 }
 0x26f   : > { %v1825_v39 = vpop.f32.mrf.mxu1 }
 0x271   : > { %v3680_v1 = vpop.f32.mrf.mxu0  ;;  %v4687_v12 = vpop.f32.mrf.mxu1 }
 0x272   : > { %4774 = vst [vmem:[#allocation9_spill] sm:$0xff] %v4687_v12  ;;  %v1692_v12 = vadd.f32 %v1663_v25, %v1418_v29  ;;  %v4779_v25 = vld [vmem:[#allocation3_spill] sm:$0xff] }
 0x273   : > { %v2104_v61 = vpop.f32.mrf.mxu0  ;;  %v1838_v2 = vpop.f32.mrf.mxu1 }
 0x274   : > { %v1854_v53 = vadd.f32 %v1825_v39, %v1692_v12 }
 0x275   : > { %v3681_v38 = vpop.f32.mrf.mxu0  ;;  %v4689_v43 = vpop.f32.mrf.mxu1 }
 0x276   : > { %4775 = vst [vmem:[#allocation10_spill] sm:$0xff] %v4689_v43  ;;  %v1419_v43 = vadd.f32 %v3608_v35, %v1118_v15 }
 0x277   : > { %v2107_v13 = vpop.f32.mrf.mxu0  ;;  %v1841_v9 = vpop.f32.mrf.mxu1 }
 0x278   : > { %v1693_v46 = vadd.f32 %v3632_v14, %v1419_v43  ;;  %v2136_v36 = vadd.f32 %v2107_v13, %v1854_v53 }
 0x279   : > { %v4691_v18 = vpop.f32.mrf.mxu0 }
 0x27a   : > { %4776 = vst [vmem:[#allocation11_spill] sm:$0xff] %v4691_v18  ;;  %v1121_v18 = vadd.f32 %v3585_v63, %v3561_v24  ;;  %v1855_v44 = vadd.f32 %v3656_v6, %v1693_v46  ;;  %v1134_v24 = vadd.f32 %v4675_v30, %v4669_v21  ;;  %v1422_v63 = vadd.f32 %v1405_v8, %v1129_v32  ;;  %v4782_v30 = vld [vmem:[#allocation6_spill] sm:$0xff] }
 0x27b   : > { %v2120_v23 = vpop.f32.mrf.mxu0  ;;  %v1857_v46 = vadd.f32 %v1838_v2, %v1695_v28  ;;  %v4785_v2 = vld [vmem:[#allocation9_spill] sm:$0xff] }
 0x27c   : > { %v1423_v5 = vadd.f32 %v4781_v47, %v1134_v24 }
 0x27d   : > { %v4693_v48 = vpop.f32.mrf.mxu0 }
 0x27e   : > { %4777 = vst [vmem:[#allocation12_spill] sm:$0xff] %v4693_v48  ;;  %v1691_v48 = vadd.f32 %v1660_v58, %v1417_v59  ;;  %v1697_v39 = vadd.f32 %v4783_v11, %v1423_v5 }
 0x27f   : > { %v2123_v54 = vpop.f32.mrf.mxu0 }
 0x280   : > { %v1853_v57 = vadd.f32 %v1822_v27, %v1691_v48  ;;  %v4780_v27 = vld [vmem:[#allocation4_spill] sm:$0xff] }
 0x281   : > { %v1137_v17 = vadd.f32 %v4780_v27, %v4779_v25  ;;  %v4784_v48 = vld [vmem:[#allocation8_spill] sm:$0xff] }
 0x282   : > { %v2135_v60 = vadd.f32 %v2104_v61, %v1853_v57 }
 0x283   : > { %v1424_v8 = vadd.f32 %v4782_v30, %v1137_v17 }
 0x28a   : > { %v3704_v49 = vpop.f32.mrf.mxu1 }
 0x28c   : > { %v2379_v50 = vpop.f32.mrf.mxu1 }
 0x28d   : > { %v2410_v14 = vadd.f32 %v2379_v50, %v2135_v60 }
 0x28e   : > { %v3705_v52 = vpop.f32.mrf.mxu1 }
 0x290   : > { %v2382_v34 = vpop.f32.mrf.mxu1 }
 0x291   : > { %v3728_v55 = vpop.f32.mrf.mxu0  ;;  %v2411_v58 = vadd.f32 %v2382_v34, %v2136_v36  ;;  %v1859_v34 = vadd.f32 %v4785_v2, %v1697_v39 }
 0x292   : > { %v4695_v19 = vpop.f32.mrf.mxu1 }
 0x293   : > { %4778 = vst [vmem:[#allocation13_spill] sm:$0xff] %v4695_v19  ;;  %v2541_v37 = vpop.f32.mrf.mxu0  ;;  %v1420_v19 = vadd.f32 %v3609_v41, %v1121_v18  ;;  %v2137_v41 = vadd.f32 %v3680_v1, %v1855_v44  ;;  %v2139_v1 = vadd.f32 %v2120_v23, %v1857_v46 }
 0x294   : > { %v2395_v56 = vpop.f32.mrf.mxu1  ;;  %v2572_v20 = vadd.f32 %v2541_v37, %v2410_v14 }
 0x295   : > { %v3729_v45 = vpop.f32.mrf.mxu0  ;;  %v1694_v3 = vadd.f32 %v3633_v7, %v1420_v19  ;;  %v1696_v7 = vadd.f32 %v1679_v62, %v1422_v63  ;;  %v2412_v6 = vadd.f32 %v3704_v49, %v2137_v41  ;;  %v1698_v62 = vadd.f32 %v4784_v48, %v1424_v8 }
 0x296   : > { %v4697_v4 = vpop.f32.mrf.mxu1  ;;  %v2414_v19 = vadd.f32 %v2395_v56, %v2139_v1 }
 0x297   : > { %v2544_v22 = vpop.f32.mrf.mxu0  ;;  %v1856_v51 = vadd.f32 %v3657_v26, %v1694_v3  ;;  %v1858_v26 = vadd.f32 %v1841_v9, %v1696_v7  ;;  %v2574_v13 = vadd.f32 %v3728_v55, %v2412_v6  ;;  %v4787_v9 = vld [vmem:[#allocation11_spill] sm:$0xff]  ;;  %v4788_v3 = vld [vmem:[#allocation12_spill] sm:$0xff] }
 0x298   : > { %v2398_v33 = vpop.f32.mrf.mxu1  ;;  %v2573_v21 = vadd.f32 %v2544_v22, %v2411_v58  ;;  %v4786_v22 = vld [vmem:[#allocation10_spill] sm:$0xff]  ;;  %v2141_v23 = vadd.f32 %v4787_v9, %v1859_v34 }
 0x299   : > { %v4699_v10 = vpop.f32.mrf.mxu0  ;;  %v2138_v53 = vadd.f32 %v3681_v38, %v1856_v51  ;;  %v2140_v38 = vadd.f32 %v2123_v54, %v1858_v26  ;;  %v1860_v15 = vadd.f32 %v4786_v22, %v1698_v62 }
 0x29a   : > { %v4789_v36 = vld [vmem:[#allocation13_spill] sm:$0xff] }
 0x29b   : > { %v2557_v35 = vpop.f32.mrf.mxu0  ;;  %v2413_v43 = vadd.f32 %v3705_v52, %v2138_v53  ;;  %v2415_v52 = vadd.f32 %v2398_v33, %v2140_v38  ;;  %v2142_v44 = vadd.f32 %v4788_v3, %v1860_v15  ;;  %v2416_v54 = vadd.f32 %v4789_v36, %v2141_v23  ;;  %v3384_v36 = vld [vmem:[%s4757_s6] ss:$0 sm:$0xff] }
 0x29c   : > { %v2576_v55 = vadd.f32 %v2557_v35, %v2414_v19 }
 0x29d   : > { %v3733_v12 = vpop.f32.mrf.mxu0  ;;  %v2575_v37 = vadd.f32 %v3729_v45, %v2413_v43  ;;  %v2417_v63 = vadd.f32 %v4697_v4, %v2142_v44  ;;  %v2578_v28 = vadd.f32 %v4699_v10, %v2416_v54 }
 0x29f   : > { %v2560_v59 = vpop.f32.mrf.mxu0  ;;  %v2579_v41 = vadd.f32 %v3733_v12, %v2417_v63 }
 0x2a0   : > { %v2577_v24 = vadd.f32 %v2560_v59, %v2415_v52  ;;  %v3383_v59 = vld [vmem:[%s4756_s5] ss:$0 sm:$0xff] }
 0x2aa   : > { %v3752_v16 = vpop.f32.mrf.mxu1 }
 0x2ab   : > { %v2856_v40 = vadd.f32 %v3752_v16, %v2574_v13 }
 0x2ac   : > { %v2823_v0 = vpop.f32.mrf.mxu1 }
 0x2ad   : > { %v2854_v18 = vadd.f32 %v2823_v0, %v2572_v20 }
 0x2ae   : > { %v3753_v57 = vpop.f32.mrf.mxu1 }
 0x2af   : > { %v2857_v32 = vadd.f32 %v3753_v57, %v2575_v37 }
 0x2b0   : > { %v2826_v61 = vpop.f32.mrf.mxu1 }
 0x2b1   : > { %v2855_v50 = vadd.f32 %v2826_v61, %v2573_v21 }
 0x2b2   : > { %v3756_v49 = vpop.f32.mrf.mxu1 }
 0x2b3   : > { %v2862_v31 = vadd.f32 %v2855_v50, %v2854_v18  ;;  %v2860_v33 = vadd.f32 %v3756_v49, %v2578_v28 }
 0x2b4   : > { %v2839_v29 = vpop.f32.mrf.mxu1 }
 0x2b5   : > { %v2863_v42 = vadd.f32 %v2862_v31, %v2856_v40  ;;  %v2858_v56 = vadd.f32 %v2839_v29, %v2576_v55 }
 0x2b6   : > { %v3757_v60 = vpop.f32.mrf.mxu1 }
 0x2b7   : > { %v2864_v45 = vadd.f32 %v2863_v42, %v2857_v32  ;;  %v2861_v14 = vadd.f32 %v3757_v60, %v2579_v41 }
 0x2b8   : > { %v2842_v16 = vpop.f32.mrf.mxu1 }
 0x2b9   : > { %v2865_v0 = vadd.f32 %v2864_v45, %v2858_v56  ;;  %v2859_v51 = vadd.f32 %v2842_v16, %v2577_v24 }
 0x2bb   : > { %v2866_v35 = vadd.f32 %v2865_v0, %v2859_v51 }
 0x2bd   : > { %v2867_v58 = vadd.f32 %v2866_v35, %v2860_v33 }
 0x2bf   : > { %v2868_v25 = vadd.f32 %v2867_v58, %v2861_v14 }
 0x2c1   : > { %v2869_v27 = vrot.slane %v2868_v25, 4 }
 0x2c3   : > { %v2870_v17 = vadd.f32 %v2869_v27, %v2868_v25 }
 0x2c5   : > { %v2871_v47 = vrot.slane %v2870_v17, 2 }
 0x2c7   : > { %v2872_v5 = vadd.f32 %v2871_v47, %v2870_v17 }
 0x2c9   : > { %v2873_v7 = vrot.slane %v2872_v5, 1 }
 0x2cb   : > { %v2874_v46 = vadd.f32 %v2873_v7, %v2872_v5 }
 0x2cd   : > { %v2875_v57 = vmul.f32 0.015625, %v2874_v46 }
 0x2cf   : > { %v2876_v53 = vsub.f32 %v2854_v18, %v2875_v57  ;;  %v2877_v6 = vsub.f32 %v2855_v50, %v2875_v57  ;;  %v2878_v4 = vsub.f32 %v2856_v40, %v2875_v57  ;;  %v2879_v20 = vsub.f32 %v2857_v32, %v2875_v57 }
 0x2d0   : > { %v2880_v30 = vsub.f32 %v2858_v56, %v2875_v57  ;;  %v2881_v39 = vsub.f32 %v2859_v51, %v2875_v57  ;;  %v2882_v12 = vsub.f32 %v2860_v33, %v2875_v57  ;;  %v2883_v13 = vsub.f32 %v2861_v14, %v2875_v57 }
 0x2d1   : > { %v2884_v10 = vmul.f32 %v2876_v53, %v2876_v53  ;;  %v2885_v21 = vmul.f32 %v2877_v6, %v2877_v6  ;;  %v2886_v8 = vmul.f32 %v2878_v4, %v2878_v4  ;;  %v2887_v26 = vmul.f32 %v2879_v20, %v2879_v20 }
 0x2d2   : > { %v2888_v61 = vmul.f32 %v2880_v30, %v2880_v30  ;;  %v2889_v48 = vmul.f32 %v2881_v39, %v2881_v39  ;;  %v2890_v2 = vmul.f32 %v2882_v12, %v2882_v12  ;;  %v2891_v18 = vmul.f32 %v2883_v13, %v2883_v13 }
 0x2d3   : > { %v2892_v11 = vadd.f32 %v2885_v21, %v2884_v10 }
 0x2d5   : > { %v2893_v1 = vadd.f32 %v2892_v11, %v2886_v8 }
 0x2d7   : > { %v2894_v43 = vadd.f32 %v2893_v1, %v2887_v26 }
 0x2d9   : > { %v2895_v62 = vadd.f32 %v2894_v43, %v2888_v61 }
 0x2db   : > { %v2896_v34 = vadd.f32 %v2895_v62, %v2889_v48 }
 0x2dd   : > { %v2897_v50 = vadd.f32 %v2896_v34, %v2890_v2 }
 0x2df   : > { %v2898_v38 = vadd.f32 %v2897_v50, %v2891_v18 }
 0x2e1   : > { %v2899_v49 = vrot.slane %v2898_v38, 4 }
 0x2e3   : > { %v2900_v19 = vadd.f32 %v2899_v49, %v2898_v38 }
 0x2e5   : > { %v2901_v37 = vrot.slane %v2900_v19, 2 }
 0x2e7   : > { %v2902_v40 = vadd.f32 %v2901_v37, %v2900_v19 }
 0x2e9   : > { %v2903_v31 = vrot.slane %v2902_v40, 1 }
 0x2eb   : > { %v2904_v22 = vadd.f32 %v2903_v31, %v2902_v40 }
 0x2ed   : > { %v2905_v15 = vmul.f32 0.015625, %v2904_v22 }
 0x2ef   : > { %v2906_v9 = vadd.f32 1e-05, %v2905_v15 }
 0x2f1   : > { %3881 = vrsqrt.f32 %v2906_v9 }
 0x2fe   : > { %v3882_v23 = vpop.eup %3881 }
 0x2ff   : > { %v2908_v29 = vmul.f32 %v3882_v23, %v2876_v53  ;;  %v2909_v52 = vmul.f32 %v3882_v23, %v2877_v6  ;;  %v2910_v55 = vmul.f32 %v3882_v23, %v2878_v4  ;;  %v2911_v32 = vmul.f32 %v3882_v23, %v2879_v20 }
 0x300   : > { %v2912_v42 = vmul.f32 %v3882_v23, %v2880_v30  ;;  %v2913_v3 = vmul.f32 %v3882_v23, %v2881_v39  ;;  %v2914_v44 = vmul.f32 %v3882_v23, %v2882_v12  ;;  %v2915_v60 = vmul.f32 %v3882_v23, %v2883_v13 }
 0x301   : > { %v2923_v54 = vmul.f32 %v3383_v59, %v2908_v29  ;;  %v2924_v24 = vmul.f32 %v3383_v59, %v2909_v52  ;;  %v2925_v56 = vmul.f32 %v3383_v59, %v2910_v55  ;;  %v2926_v45 = vmul.f32 %v3383_v59, %v2911_v32 }
 0x302   : > { %v2927_v16 = vmul.f32 %v3383_v59, %v2912_v42  ;;  %v2928_v63 = vmul.f32 %v3383_v59, %v2913_v3  ;;  %v2929_v28 = vmul.f32 %v3383_v59, %v2914_v44  ;;  %v2930_v0 = vmul.f32 %v3383_v59, %v2915_v60 }
 0x303   : > { %v2938_v51 = vadd.f32 %v3384_v36, %v2923_v54  ;;  %v2939_v41 = vadd.f32 %v3384_v36, %v2924_v24  ;;  %v2940_v33 = vadd.f32 %v3384_v36, %v2925_v56  ;;  %v2941_v35 = vadd.f32 %v3384_v36, %v2926_v45 }
 0x304   : > { %v2942_v14 = vadd.f32 %v3384_v36, %v2927_v16  ;;  %v2943_v58 = vadd.f32 %v3384_v36, %v2928_v63  ;;  %v4723_v25 = vadd.f32 %v3384_v36, %v2929_v28  ;;  %v4725_v27 = vadd.f32 %v3384_v36, %v2930_v0 }
 0x305   : > { %v2954_v17 = vmin.f32 %v2938_v51, 0.0  ;;  %v2955_v47 = vmin.f32 %v2939_v41, 0.0  ;;  %v2956_v5 = vmin.f32 %v2940_v33, 0.0  ;;  %v2957_v7 = vmin.f32 %v2941_v35, 0.0 }
 0x306   : > { %v2958_v46 = vmin.f32 %v2942_v14, 0.0  ;;  %v2959_v57 = vmin.f32 %v2943_v58, 0.0  ;;  %v2960_v53 = vmin.f32 %v4723_v25, 0.0  ;;  %v2961_v10 = vmin.f32 %v4725_v27, 0.0 }
 0x307   : > { %v2962_v6 = vmul.f32 1.442695, %v2954_v17  ;;  %v2964_v4 = vmul.f32 1.442695, %v2955_v47  ;;  %v2966_v20 = vmul.f32 1.442695, %v2956_v5 }
 0x308   : > { %v2968_v21 = vmul.f32 1.442695, %v2957_v7  ;;  %v2970_v30 = vmul.f32 1.442695, %v2958_v46  ;;  %v2972_v8 = vmul.f32 1.442695, %v2959_v57 }
 0x309   : > { %3883 = vpow2.f32 %v2962_v6  ;;  %v2974_v11 = vmul.f32 1.442695, %v2960_v53  ;;  %v2976_v39 = vmul.f32 1.442695, %v2961_v10  ;;  %vm2946_vm3 = vcmp.gt.f32.partialorder %v2938_v51, 0.0 }
 0x30a   : > { %3885 = vpow2.f32 %v2964_v4  ;;  %vm2947_vm4 = vcmp.gt.f32.partialorder %v2939_v41, 0.0  ;;  %vm2948_vm5 = vcmp.gt.f32.partialorder %v2940_v33, 0.0  ;;  %vm2949_vm6 = vcmp.gt.f32.partialorder %v2941_v35, 0.0 }
 0x30b   : > { %3887 = vpow2.f32 %v2966_v20  ;;  %vm2950_vm7 = vcmp.gt.f32.partialorder %v2942_v14, 0.0  ;;  %vm2951_vm8 = vcmp.gt.f32.partialorder %v2943_v58, 0.0  ;;  %vm2952_vm9 = vcmp.gt.f32.partialorder %v4723_v25, 0.0 }
 0x30c   : > { %3889 = vpow2.f32 %v2968_v21  ;;  %vm2953_vm10 = vcmp.gt.f32.partialorder %v4725_v27, 0.0 }
 0x30d   : > { %3891 = vpow2.f32 %v2970_v30 }
 0x30e   : > { %3893 = vpow2.f32 %v2972_v8 }
 0x30f   : > { %3895 = vpow2.f32 %v2974_v11 }
 0x310   : > { %3897 = vpow2.f32 %v2976_v39 }
 0x316   : > { %v3884_v26 = vpop.eup %3883 }
 0x317   : > { %v3886_v1 = vpop.eup %3885  ;;  %v3385_v12 = vadd.f32 -1.0, %v3884_v26 }
 0x318   : > { %v3888_v61 = vpop.eup %3887  ;;  %v3386_v43 = vadd.f32 -1.0, %v3886_v1 }
 0x319   : > { %v3890_v13 = vpop.eup %3889  ;;  %v3387_v48 = vadd.f32 -1.0, %v3888_v61  ;;  %v2986_v62 = vsel %vm2946_vm3, %v2938_v51, %v3385_v12 }
 0x31a   : > { %v3892_v2 = vpop.eup %3891  ;;  %v3388_v34 = vadd.f32 -1.0, %v3890_v13  ;;  %v2987_v18 = vsel %vm2947_vm4, %v2939_v41, %v3386_v43  ;;  %2994 = vst [vmem:[%s4734_s11] sm:$0xff] %v2986_v62 }
 0x31b   : > { %v3894_v50 = vpop.eup %3893  ;;  %v3389_v38 = vadd.f32 -1.0, %v3892_v2  ;;  %v2988_v49 = vsel %vm2948_vm5, %v2940_v33, %v3387_v48  ;;  %2995 = vst [vmem:[%s4734_s11 + $0x8] sm:$0xff] %v2987_v18 }
 0x31c   : > { %v3896_v19 = vpop.eup %3895  ;;  %v3390_v37 = vadd.f32 -1.0, %v3894_v50  ;;  %v2989_v40 = vsel %vm2949_vm6, %v2941_v35, %v3388_v34  ;;  %2996 = vst [vmem:[%s4734_s11 + $0x10] sm:$0xff] %v2988_v49 }
 0x31d   : > { %v3898_v31 = vpop.eup %3897  ;;  %v3391_v22 = vadd.f32 -1.0, %v3896_v19  ;;  %v2990_v15 = vsel %vm2950_vm7, %v2942_v14, %v3389_v38  ;;  %2997 = vst [vmem:[%s4734_s11 + $0x18] sm:$0xff] %v2989_v40 }
 0x31e   : > { %v3392_v9 = vadd.f32 -1.0, %v3898_v31  ;;  %v2991_v23 = vsel %vm2951_vm8, %v2943_v58, %v3390_v37  ;;  %2998 = vst [vmem:[%s4734_s11 + $0x20] sm:$0xff] %v2990_v15 }
 0x31f   : > { %v2992_v59 = vsel %vm2952_vm9, %v4723_v25, %v3391_v22  ;;  %2999 = vst [vmem:[%s4734_s11 + $0x28] sm:$0xff] %v2991_v23 }
 0x320   : > { %v2993_v29 = vsel %vm2953_vm10, %v4725_v27, %v3392_v9  ;;  %3000 = vst [vmem:[%s4734_s11 + $0x30] sm:$0xff] %v2992_v59 }
 0x321   : > { %3001 = vst [vmem:[%s4734_s11 + $0x38] sm:$0xff] %v2993_v29 }
 0x322 PF: > { %s19_s27 = sadd.s32 1, %s3905_s27  }
 0x323   : > { %p16_p4 = scmp.ge.s32.totalorder %s19_s27, 4  }
 0x325   :  { %18 = sbr.rel (!%p16_p4) target bundleno = 1 (0x1), region = 101 }

</bundles_post_ra>
